<compile_context>
chip_gen: v6e
topology: v6e:2x2x1
jax: 0.10.0
libtpu: 0.0.40
codegen_flags: <defaults>
</compile_context>

<pallas_src>
import functools

import jax
import jax.numpy as jnp
from jax.experimental import pallas as pl
from jax.experimental.pallas import tpu as pltpu

C_IN = 128            # gate in_channels
C_CAT = 2 * C_IN      # channels of the concatenated [input, gating] features
GATE_ROW = C_CAT      # row of the fused weight that holds the gate conv wg
C_EXT = 272           # 256 conv rows + 1 gate row + zero pad (16-sublane aligned)
EPS = 1e-5


# ----------------------------------------------------------------------------
# Pallas kernel
# ----------------------------------------------------------------------------
def _gate_kernel(f1_ref, f2_ref,        # VMEM (1, 128, tm) bf16 feature blocks
                 w1a_ref, w1b_ref,      # VMEM (272, 128) bf16 (BN(256)+wg folded in)
                 b1_ref,                # VMEM (272, 1) f32    (BN(256) folded, 0 past 256)
                 w2_ref,                # VMEM (272, 1) f32    (BN(1) scale folded, 0 past 256)
                 t2_ref,                # SMEM (1, 1)   f32    BN(1) shift (b2 folded in)
                 out_ref):              # VMEM (1, 1, tm) f32
    x1 = f1_ref[0].astype(jnp.bfloat16)   # (128, tm); no-op when input is bf16
    x2 = f2_ref[0].astype(jnp.bfloat16)

    # Fused matmul: rows 0:256 are Conv2d(256,256,1) with BatchNorm2d(256)
    # folded in (split across the two concat halves, so no channel concat);
    # row 256 is the gate conv weight wg applied to both halves, i.e.
    # h[256] = wg·x1 + wg·x2 = (x1+x2)·wg ; rows 257.. are zero padding.
    h = (jnp.dot(w1a_ref[...], x1, preferred_element_type=jnp.float32)
         + jnp.dot(w1b_ref[...], x2, preferred_element_type=jnp.float32)
         + b1_ref[...])                                        # (272, tm) f32

    # Gate-conv pre-activation, taken BEFORE the ReLU (it is signed).
    y_pre = h[GATE_ROW:GATE_ROW + 1]                           # (1, tm)

    hr = jnp.maximum(h, 0.0)                                   # ReLU (rows >=256 unused)

    # Conv2d(256, 1, 1) + BatchNorm2d(1) (folded) as VPU mul + sublane reduce;
    # w2 rows >= 256 are zero so the extra rows never contribute.
    z = jnp.sum(hr * w2_ref[...], axis=0, keepdims=True) + t2_ref[0, 0]   # (1, tm)
    alphas = jax.nn.sigmoid(z)

    # ((x1+x2)*alphas) @ wg == alphas * ((x1+x2)@wg) == alphas * y_pre,
    # followed by the outer sigmoid applied by PFAN_OD.forward.
    out_ref[0] = jax.nn.sigmoid(y_pre * alphas)


# ----------------------------------------------------------------------------
# Wrapper
# ----------------------------------------------------------------------------
@functools.partial(jax.jit, static_argnames=("tm",))
def pfan_od_gate(features1, features2, kernel_params, tm=4096):
    """features1/features2: NCHW (N, 128, H, W), ideally bf16.  Returns (N,1,H,W) f32."""
    N, C, H, W = features1.shape
    assert C == C_IN
    HW = H * W

    # Free reshapes only — no transpose, no pad, no dtype cast in the wrapper.
    f1 = features1.reshape(N, C, HW)
    f2 = features2.reshape(N, C, HW)

    w1a, w1b, b1e, w2e, t2 = kernel_params

    # Spatial tile: as large as possible.  When tiling (tm < HW) keep it a
    # multiple of 512 so each strided-DMA row is >= 2 KiB contiguous (bf16).
    tm_eff = min(tm, HW)
    if tm_eff < HW:
        align = 512 if tm_eff >= 512 else 128
        tm_eff = max(align, (tm_eff // align) * align)
    # Megacore (v7x has 2 TensorCores): guarantee at least 2 grid blocks when
    # the problem is big enough to split on a 128-lane boundary.
    if N * pl.cdiv(HW, tm_eff) < 2 and HW >= 2 * 128:
        tm_eff = (((HW + 1) // 2) + 127) // 128 * 128

    grid = (N, pl.cdiv(HW, tm_eff))

    in_bytes = features1.dtype.itemsize
    cost = pl.CostEstimate(
        flops=4 * C_EXT * C_IN * N * HW,                    # two (272x128)@(128,HW) matmuls
        transcendentals=2 * N * HW,                         # two sigmoids per pixel
        bytes_accessed=(2 * N * C_IN * HW * in_bytes        # feature reads
                        + N * HW * 4                        # f32 output
                        + 2 * C_EXT * C_IN * 2 + 2 * C_EXT * 4),
    )

    out = pl.pallas_call(
        _gate_kernel,
        out_shape=jax.ShapeDtypeStruct((N, 1, HW), jnp.float32),
        grid_spec=pltpu.PrefetchScalarGridSpec(
            num_scalar_prefetch=0,
            grid=grid,
            in_specs=[
                pl.BlockSpec((1, C, tm_eff), lambda n, m: (n, 0, m)),     # f1
                pl.BlockSpec((1, C, tm_eff), lambda n, m: (n, 0, m)),     # f2
                pl.BlockSpec((C_EXT, C_IN), lambda n, m: (0, 0)),         # w1a (+wg row)
                pl.BlockSpec((C_EXT, C_IN), lambda n, m: (0, 0)),         # w1b (+wg row)
                pl.BlockSpec((C_EXT, 1), lambda n, m: (0, 0)),            # b1'
                pl.BlockSpec((C_EXT, 1), lambda n, m: (0, 0)),            # w2'
                pl.BlockSpec(memory_space=pltpu.MemorySpace.SMEM),        # t2
            ],
            out_specs=pl.BlockSpec((1, 1, tm_eff), lambda n, m: (n, 0, m)),
        ),
        compiler_params=pltpu.CompilerParams(
            dimension_semantics=("parallel", "parallel"),
            vmem_limit_bytes=48 * 1024 * 1024),
        cost_estimate=cost,
    )(f1, f2, w1a, w1b, b1e, w2e, t2)

    return out.reshape(N, 1, H, W)


# ----------------------------------------------------------------------------
# Parameters (synthetic stand-ins, torch-eval semantics) + folding
# ----------------------------------------------------------------------------
def make_raw_gate_params(key):
    """Deterministic synthetic params for GatedSpatialConv2d(128, 1), eval mode."""
    ks = jax.random.split(key, 10)
    g1 = 1.0 + 0.1 * jax.random.normal(ks[0], (C_CAT,), jnp.float32)
    beta1 = 0.1 * jax.random.normal(ks[1], (C_CAT,), jnp.float32)
    rm1 = 0.1 * jax.random.normal(ks[2], (C_CAT,), jnp.float32)
    rv1 = 1.0 + 0.1 * jax.random.uniform(ks[3], (C_CAT,), jnp.float32)
    w1 = 0.05 * jax.random.normal(ks[4], (C_CAT, C_CAT), jnp.float32)   # (out, in)
    b1 = 0.05 * jax.random.normal(ks[5], (C_CAT,), jnp.float32)
    w2 = 0.05 * jax.random.normal(ks[6], (C_CAT,), jnp.float32)         # (in,)
    b2 = 0.05 * jax.random.normal(ks[7], (), jnp.float32)
    g2, beta2 = jnp.float32(1.1), jnp.float32(-0.05)
    rm2, rv2 = jnp.float32(0.02), jnp.float32(0.9)
    wg = 0.05 * jax.random.normal(ks[8], (C_IN,), jnp.float32)          # (in,)
    return dict(g1=g1, beta1=beta1, rm1=rm1, rv1=rv1, w1=w1, b1=b1,
                w2=w2, b2=b2, g2=g2, beta2=beta2, rm2=rm2, rv2=rv2, wg=wg)


def fold_gate_params(raw):
    """Fold BatchNorms into the 1x1 convs, fuse the gate conv wg as an extra
    output row of W1, and lay out operands for the kernel."""
    bn1s = raw["g1"] / jnp.sqrt(raw["rv1"] + EPS)                # (256,)
    bn1t = raw["beta1"] - raw["rm1"] * bn1s                      # (256,)
    w1f = raw["w1"] * bn1s[None, :]                              # (256_out, 256_in)
    b1f = raw["b1"] + raw["w1"] @ bn1t                           # (256,)

    # Extended weights: rows 0:256 = folded conv1 halves, row 256 = wg, rest 0.
    w1a = (jnp.zeros((C_EXT, C_IN), jnp.float32)
           .at[:C_CAT].set(w1f[:, :C_IN])
           .at[GATE_ROW].set(raw["wg"]))
    w1b = (jnp.zeros((C_EXT, C_IN), jnp.float32)
           .at[:C_CAT].set(w1f[:, C_IN:])
           .at[GATE_ROW].set(raw["wg"]))
    b1e = jnp.zeros((C_EXT,), jnp.float32).at[:C_CAT].set(b1f)   # gate row bias = 0

    s2 = raw["g2"] / jnp.sqrt(raw["rv2"] + EPS)
    t2 = raw["beta2"] + (raw["b2"] - raw["rm2"]) * s2
    w2e = jnp.zeros((C_EXT,), jnp.float32).at[:C_CAT].set(raw["w2"] * s2)

    return (w1a.astype(jnp.bfloat16),
            w1b.astype(jnp.bfloat16),
            b1e.reshape(C_EXT, 1),
            w2e.reshape(C_EXT, 1),
            jnp.asarray(t2, jnp.float32).reshape(1, 1))


# ----------------------------------------------------------------------------
# Pure-JAX reference (GatedSpatialConv2d + outer sigmoid, torch semantics, f32)
# ----------------------------------------------------------------------------
def reference_gate(features1, features2, raw):
    N, C, H, W = features1.shape
    f1 = jnp.transpose(features1.astype(jnp.float32), (0, 2, 3, 1)).reshape(-1, C)
    f2 = jnp.transpose(features2.astype(jnp.float32), (0, 2, 3, 1)).reshape(-1, C)
    x = jnp.concatenate([f1, f2], axis=-1)                                  # (M, 256)
    xbn = (x - raw["rm1"]) / jnp.sqrt(raw["rv1"] + EPS) * raw["g1"] + raw["beta1"]
    h = jnp.maximum(xbn @ raw["w1"].T + raw["b1"], 0.0)
    zc = h @ raw["w2"] + raw["b2"]                                          # (M,)
    z = (zc - raw["rm2"]) / jnp.sqrt(raw["rv2"] + EPS) * raw["g2"] + raw["beta2"]
    alphas = jax.nn.sigmoid(z)[:, None]
    y = ((f1 + f2) * alphas) @ raw["wg"]                                    # (M,)
    out = jax.nn.sigmoid(y).reshape(N, H, W, 1)
    return jnp.transpose(out, (0, 3, 1, 2))


if __name__ == "__main__":
    key = jax.random.PRNGKey(0)
    kf1, kf2, kp = jax.random.split(key, 3)

    N, H, W = 2, 16, 16
    # Synthetic stand-ins for the two PFAN feature maps (128 channels, NCHW),
    # emitted in bf16 as the backbones would (no wrapper-side cast).
    # TODO(synk): in the real model these come from the global/local PFAN nets.
    features1 = jax.random.normal(kf1, (N, C_IN, H, W), jnp.bfloat16)
    features2 = jax.random.normal(kf2, (N, C_IN, H, W), jnp.bfloat16)

    raw = make_raw_gate_params(kp)
    params = fold_gate_params(raw)

    out = pfan_od_gate(features1, features2, params)
    out = jax.block_until_ready(out)

    ref = reference_gate(features1, features2, raw)
    assert out.shape == (N, 1, H, W), out.shape
    # bf16 matmul operands (incl. the fused gate row) -> relaxed tolerance
    # vs the f32 reference; accumulation is f32 and outputs are post-sigmoid.
    assert jnp.allclose(out, ref, rtol=1e-2, atol=1e-2), \
        float(jnp.max(jnp.abs(out - ref)))

    print("KERNEL_OK")
</pallas_src>

<mosaic_0001>
module attributes {stable_mosaic.version = 11 : i64} {
  func.func @_gate_kernel(%arg0: i32, %arg1: i32, %arg2: memref<1x128x256xbf16, #tpu.memory_space<vmem>>, %arg3: memref<1x128x256xbf16, #tpu.memory_space<vmem>>, %arg4: memref<272x128xbf16, #tpu.memory_space<vmem>>, %arg5: memref<272x128xbf16, #tpu.memory_space<vmem>>, %arg6: memref<272x1xf32, #tpu.memory_space<vmem>>, %arg7: memref<272x1xf32, #tpu.memory_space<vmem>>, %arg8: memref<1x1xf32, #tpu.memory_space<smem>>, %arg9: memref<1x1x256xf32, #tpu.memory_space<vmem>>) attributes {dimension_semantics = [#tpu.dimension_semantics<parallel>, #tpu.dimension_semantics<parallel>], iteration_bounds = array<i64: 2, 1>, scalar_prefetch = 0 : i64, scratch_operands = 0 : i64, tpu.core_type = #tpu.core_type<tc>, window_params = [{transform_indices = @transform_0, window_bounds = array<i64: 1, 128, 256>}, {transform_indices = @transform_1, window_bounds = array<i64: 1, 128, 256>}, {pipeline_mode = #tpu.pipeline_mode<synchronous>, transform_indices = @transform_2, window_bounds = array<i64: 272, 128>}, {pipeline_mode = #tpu.pipeline_mode<synchronous>, transform_indices = @transform_3, window_bounds = array<i64: 272, 128>}, {pipeline_mode = #tpu.pipeline_mode<synchronous>, transform_indices = @transform_4, window_bounds = array<i64: 272, 1>}, {pipeline_mode = #tpu.pipeline_mode<synchronous>, transform_indices = @transform_5, window_bounds = array<i64: 272, 1>}, {transform_indices = @transform_6, window_bounds = array<i64: 1, 1>}, {transform_indices = @transform_7, window_bounds = array<i64: 1, 1, 256>}]} {
    %c0 = arith.constant 0 : index
    %c0_0 = arith.constant 0 : index
    %c0_1 = arith.constant 0 : index
    %0 = vector.load %arg2[%c0, %c0_0, %c0_1] : memref<1x128x256xbf16, #tpu.memory_space<vmem>>, vector<1x128x256xbf16>
    %1 = vector.shape_cast %0 : vector<1x128x256xbf16> to vector<128x256xbf16>
    %c0_2 = arith.constant 0 : index
    %c0_3 = arith.constant 0 : index
    %c0_4 = arith.constant 0 : index
    %2 = vector.load %arg3[%c0_2, %c0_3, %c0_4] : memref<1x128x256xbf16, #tpu.memory_space<vmem>>, vector<1x128x256xbf16>
    %3 = vector.shape_cast %2 : vector<1x128x256xbf16> to vector<128x256xbf16>
    %c0_5 = arith.constant 0 : index
    %c0_6 = arith.constant 0 : index
    %4 = vector.load %arg4[%c0_5, %c0_6] : memref<272x128xbf16, #tpu.memory_space<vmem>>, vector<272x128xbf16>
    %cst = arith.constant dense<0.000000e+00> : vector<272x256xf32>
    %5 = tpu.matmul %4, %1, %cst {dimension_numbers = #tpu.dot_dimension_numbers<[1], [0], [0], [1], [0, 0, 1, 1], [], []>} : vector<272x128xbf16>, vector<128x256xbf16>, vector<272x256xf32> -> vector<272x256xf32>
    %c0_7 = arith.constant 0 : index
    %c0_8 = arith.constant 0 : index
    %6 = vector.load %arg5[%c0_7, %c0_8] : memref<272x128xbf16, #tpu.memory_space<vmem>>, vector<272x128xbf16>
    %cst_9 = arith.constant dense<0.000000e+00> : vector<272x256xf32>
    %7 = tpu.matmul %6, %3, %cst_9 {dimension_numbers = #tpu.dot_dimension_numbers<[1], [0], [0], [1], [0, 0, 1, 1], [], []>} : vector<272x128xbf16>, vector<128x256xbf16>, vector<272x256xf32> -> vector<272x256xf32>
    %8 = arith.addf %5, %7 : vector<272x256xf32>
    %c0_10 = arith.constant 0 : index
    %c0_11 = arith.constant 0 : index
    %9 = vector.load %arg6[%c0_10, %c0_11] : memref<272x1xf32, #tpu.memory_space<vmem>>, vector<272x1xf32>
    %10 = vector.broadcast %9 : vector<272x1xf32> to vector<272x256xf32>
    %11 = arith.addf %8, %10 : vector<272x256xf32>
    %12 = vector.extract_strided_slice %11 {offsets = [256, 0], sizes = [1, 256], strides = [1, 1]} : vector<272x256xf32> to vector<1x256xf32>
    %cst_12 = arith.constant 0.000000e+00 : f32
    %13 = vector.broadcast %cst_12 : f32 to vector<272x256xf32>
    %14 = arith.maximumf %11, %13 : vector<272x256xf32>
    %c0_13 = arith.constant 0 : index
    %c0_14 = arith.constant 0 : index
    %15 = vector.load %arg7[%c0_13, %c0_14] : memref<272x1xf32, #tpu.memory_space<vmem>>, vector<272x1xf32>
    %16 = vector.broadcast %15 : vector<272x1xf32> to vector<272x256xf32>
    %17 = arith.mulf %14, %16 : vector<272x256xf32>
    %cst_15 = arith.constant dense<0.000000e+00> : vector<256xf32>
    %18 = vector.multi_reduction <add>, %17, %cst_15 [0] : vector<272x256xf32> to vector<256xf32>
    %19 = vector.shape_cast %18 : vector<256xf32> to vector<1x256xf32>
    %c0_16 = arith.constant 0 : index
    %c0_17 = arith.constant 0 : index
    %20 = memref.load %arg8[%c0_16, %c0_17] : memref<1x1xf32, #tpu.memory_space<smem>>
    %21 = vector.broadcast %20 : f32 to vector<1x256xf32>
    %22 = arith.addf %19, %21 : vector<1x256xf32>
    %23 = arith.negf %22 : vector<1x256xf32>
    %24 = math.exp %23 : vector<1x256xf32>
    %cst_18 = arith.constant 1.000000e+00 : f32
    %25 = vector.broadcast %cst_18 : f32 to vector<1x256xf32>
    %26 = arith.addf %25, %24 : vector<1x256xf32>
    %27 = arith.divf %25, %26 : vector<1x256xf32>
    %28 = arith.mulf %12, %27 : vector<1x256xf32>
    %29 = arith.negf %28 : vector<1x256xf32>
    %30 = math.exp %29 : vector<1x256xf32>
    %cst_19 = arith.constant 1.000000e+00 : f32
    %31 = vector.broadcast %cst_19 : f32 to vector<1x256xf32>
    %32 = arith.addf %31, %30 : vector<1x256xf32>
    %33 = arith.divf %31, %32 : vector<1x256xf32>
    %c0_20 = arith.constant 0 : index
    %c0_21 = arith.constant 0 : index
    %c0_22 = arith.constant 0 : index
    %34 = vector.load %arg9[%c0_20, %c0_21, %c0_22] : memref<1x1x256xf32, #tpu.memory_space<vmem>>, vector<1x1x256xf32>
    %35 = vector.shape_cast %34 : vector<1x1x256xf32> to vector<1x256xf32>
    %36 = vector.shape_cast %33 : vector<1x256xf32> to vector<1x1x256xf32>
    tpu.vector_store %arg9[%c0_20, %c0_21, %c0_22], %36 {strides = array<i32>} : memref<1x1x256xf32, #tpu.memory_space<vmem>>, vector<1x1x256xf32>,
    return
  }
  func.func @transform_0(%arg0: i32, %arg1: i32) -> (i32, i32, i32) {
    %c0_i32 = arith.constant 0 : i32
    %c0_i32_0 = arith.constant 0 : i32
    return %arg0, %c0_i32, %arg1 : i32, i32, i32
  }
  func.func @transform_1(%arg0: i32, %arg1: i32) -> (i32, i32, i32) {
    %c0_i32 = arith.constant 0 : i32
    %c0_i32_0 = arith.constant 0 : i32
    return %arg0, %c0_i32, %arg1 : i32, i32, i32
  }
  func.func @transform_2(%arg0: i32, %arg1: i32) -> (i32, i32) {
    %c0_i32 = arith.constant 0 : i32
    %c0_i32_0 = arith.constant 0 : i32
    %c0_i32_1 = arith.constant 0 : i32
    return %c0_i32, %c0_i32_0 : i32, i32
  }
  func.func @transform_3(%arg0: i32, %arg1: i32) -> (i32, i32) {
    %c0_i32 = arith.constant 0 : i32
    %c0_i32_0 = arith.constant 0 : i32
    %c0_i32_1 = arith.constant 0 : i32
    return %c0_i32, %c0_i32_0 : i32, i32
  }
  func.func @transform_4(%arg0: i32, %arg1: i32) -> (i32, i32) {
    %c0_i32 = arith.constant 0 : i32
    %c0_i32_0 = arith.constant 0 : i32
    %c0_i32_1 = arith.constant 0 : i32
    return %c0_i32, %c0_i32_0 : i32, i32
  }
  func.func @transform_5(%arg0: i32, %arg1: i32) -> (i32, i32) {
    %c0_i32 = arith.constant 0 : i32
    %c0_i32_0 = arith.constant 0 : i32
    %c0_i32_1 = arith.constant 0 : i32
    return %c0_i32, %c0_i32_0 : i32, i32
  }
  func.func @transform_6(%arg0: i32, %arg1: i32) -> (i32, i32) {
    %c0_i32 = arith.constant 0 : i32
    %c0_i32_0 = arith.constant 0 : i32
    %c0_i32_1 = arith.constant 0 : i32
    return %c0_i32, %c0_i32_0 : i32, i32
  }
  func.func @transform_7(%arg0: i32, %arg1: i32) -> (i32, i32, i32) {
    %c0_i32 = arith.constant 0 : i32
    %c0_i32_0 = arith.constant 0 : i32
    return %arg0, %c0_i32, %arg1 : i32, i32, i32
  }
}

</mosaic_0001>

<bundles_post_ra>
// kernel: pfan_od_gate.1
= control target key start
LH: loop header
LB: loop body
LE: loop exit
PB: predicated region body
PF: predicated region fallthrough
CT: control target
= control target key end

     0   :  { %s2345_s26 = smov 0   ;;  %s2347_s27 = smov 0   ;;  %s2993_s0 = inlined_call_operand.vmem [shape: bf16[2,128,256], index: 0, kind: input, shape index: {}]   ;;  %s2994_s1 = inlined_call_operand.vmem [shape: bf16[2,128,256], index: 1, kind: input, shape index: {}]   ;;  %s2995_s2 = inlined_call_operand.vmem [shape: bf16[272,128], index: 2, kind: input, shape index: {}]   ;;  %s2996_s3 = inlined_call_operand.vmem [shape: bf16[272,128], index: 3, kind: input, shape index: {}]   ;;  %s2997_s4 = inlined_call_operand.vmem [shape: f32[272,1], index: 4, kind: input, shape index: {}]   ;;  %s2998_s5 = inlined_call_operand.vmem [shape: f32[272,1], index: 5, kind: input, shape index: {}]   ;;  %s2999_s6 = inlined_call_operand.<no memory space> [shape: f32[1,1], index: 6, kind: input, shape index: {}]   ;;  %s3000_s7 = inlined_call_operand.vmem [shape: f32[2,1,256], index: 7, kind: output, shape index: {}]  }
   0x1   :  { %12 = sst [smem:[#allocation2]] %s2999_s6  ;;  %s2349_s28 = smov 0  }
   0x2 LB: > { %s30_s6 = sadd.s32 1, %s2294_s27  ;;  %p2070_p0 = scmp.ge.s32.totalorder %s2298_s28, 1  ;;  %s2298_s28 = sphi %s2349_s28, %s18_s28   ;;  %s2294_s27 = sphi %s2347_s27, %s3011_s27   ;;  %s2290_s26 = sphi %s2345_s26, %s3010_s26  }
   0x3   : > { %p32_p1 = scmp.ge.s32.totalorder %s30_s6, 2  ;;  %p276_p2 = scmp.lt.s32.totalorder %s2298_s28, 3 }
   0x5   : > { %s3013_s6 = smov (%p32_p1, %s30_s6), 0  ;;  %p277_p3 = pnand %p2070_p0, %p276_p2 }
   0x7   : > { %280 = sbr.rel (%p277_p3) target bundleno = 475 (0x1db), region = 48 }
   0xc   : > { %v1226_v0 = vld [vmem:[%s2997_s4 + $0x10] sm:$0xff]  ;;  %v1224_v1 = vld [vmem:[%s2997_s4] sm:$0xff]  ;;  %p325_p4 = scmp.lt.s32.totalorder %s2290_s26, 1  ;;  %v2300_v2 = vmov 0   ;;  %v1227_v3 = vld [vmem:[%s2997_s4 + $0x18] sm:$0xff]  ;;  %s1914_s21 = sld [smem:[#allocation2]] }
   0xd   : > { %2177 = vset.pattern.permute.xlu1 %v2300_v2  ;;  %2176 = vset.pattern.permute.xlu0 %v2300_v2  ;;  %v1225_v4 = vld [vmem:[%s2997_s4 + $0x8] sm:$0xff]  ;;  %v1228_v6 = vld [vmem:[%s2997_s4 + $0x20] sm:$0xff]  ;;  %v1231_v12 = vld [vmem:[%s2997_s4 + $0x38] sm:$0xff] }
   0xe   : > { %1270 = vperm.xlu1 %2177, %v1226_v0   ;;  %1260 = vperm.xlu0 %2176, %v1224_v1   ;;  %s3015_s26 = smov (!%p325_p4, %s2290_s26), 1  ;;  %v1229_v5 = vld [vmem:[%s2997_s4 + $0x28] sm:$0xff]  ;;  %v1230_v13 = vld [vmem:[%s2997_s4 + $0x30] sm:$0xff]  ;;  %v1232_v20 = vld [vmem:[%s2997_s4 + $0x40] sm:$0xff] }
   0xf   : > { %668 = vmatprep.mubr.bf16.mxu0 %v2300_v2  ;;  %1053 = vmatprep.mubr.bf16.mxu1 %v2300_v2  ;;  %s2148_s14 = sshll.u32 %s3015_s26, 7  ;;  %v1233_v19 = vld [vmem:[%s2997_s4 + $0x48] sm:$0xff]  ;;  %v1235_v25 = vld [vmem:[%s2997_s4 + $0x58] sm:$0xff]  ;;  %v1234_v26 = vld [vmem:[%s2997_s4 + $0x50] sm:$0xff]  ;;  %s2075_s22 = sshll.u32 %s3015_s26, 1 }
  0x10   : > { %s2385_s17 = scalar_lea.vmem %s2994_s1, %s2148_s14  ;;  %s2390_s20 = scalar_lea.vmem %s2993_s0, %s2148_s14  ;;  %v1237_v31 = vld [vmem:[%s2997_s4 + $0x68] sm:$0xff]  ;;  %v1236_v32 = vld [vmem:[%s2997_s4 + $0x60] sm:$0xff]  ;;  %v1567_v43 = vld [vmem:[%s2998_s5 + $0x18] sm:$0xff] }
  0x11   : > { %v2178_v7 = vld [vmem:[%s2385_s17 + $0x74] ss:$8 sps:$4 sm:$0xff]   ;;  %v2182_v9 = vld [vmem:[%s2385_s17 + $0x70] ss:$8 sps:$4 sm:$0xff]   ;;  %v2184_v11 = vld [vmem:[%s2385_s17 + $0x64] ss:$8 sps:$4 sm:$0xff]   ;;  %s351_s23 = scalar_lea.vmem %s3000_s7, %s2075_s22 }
  0x12   : > { %1275 = vperm.xlu1 %2177, %v1227_v3   ;;  %1265 = vperm.xlu0 %2176, %v1225_v4   ;;  %v2180_v8 = vld [vmem:[%s2390_s20 + $0x74] ss:$8 sps:$4 sm:$0xff]   ;;  %v2183_v10 = vld [vmem:[%s2390_s20 + $0x70] ss:$8 sps:$4 sm:$0xff]   ;;  %v2186_v14 = vld [vmem:[%s2390_s20 + $0x64] ss:$8 sps:$4 sm:$0xff]  }
  0x13   : > { %636 = vmatprep.subr.bf16.mxu0 %v2178_v7  ;;  %1021 = vmatprep.subr.bf16.mxu1 %v2180_v8  ;;  %v2188_v15 = vld [vmem:[%s2385_s17 + $0x60] ss:$8 sps:$4 sm:$0xff]   ;;  %v2190_v17 = vld [vmem:[%s2385_s17 + $0x54] ss:$8 sps:$4 sm:$0xff]   ;;  %v2194_v21 = vld [vmem:[%s2385_s17 + $0x50] ss:$8 sps:$4 sm:$0xff]  }
  0x14   : > { %637 = vmatpush1.bf16.msra.mxu0 %v2182_v9  ;;  %1022 = vmatpush1.bf16.msra.mxu1 %v2183_v10  ;;  %v2189_v16 = vld [vmem:[%s2390_s20 + $0x60] ss:$8 sps:$4 sm:$0xff]   ;;  %v2192_v18 = vld [vmem:[%s2390_s20 + $0x54] ss:$8 sps:$4 sm:$0xff]   ;;  %v2195_v22 = vld [vmem:[%s2390_s20 + $0x50] ss:$8 sps:$4 sm:$0xff]  }
  0x15   : > { %638 = vmatprep.subr.bf16.mxu0 %v2184_v11  ;;  %1023 = vmatprep.subr.bf16.mxu1 %v2186_v14  ;;  %v2196_v23 = vld [vmem:[%s2385_s17 + $0x44] ss:$8 sps:$4 sm:$0xff]   ;;  %v2200_v27 = vld [vmem:[%s2385_s17 + $0x40] ss:$8 sps:$4 sm:$0xff]   ;;  %v2202_v29 = vld [vmem:[%s2385_s17 + $0x34] ss:$8 sps:$4 sm:$0xff]  }
  0x16   : > { %1285 = vperm.xlu1 %2177, %v1229_v5   ;;  %1280 = vperm.xlu0 %2176, %v1228_v6   ;;  %v2198_v24 = vld [vmem:[%s2390_s20 + $0x44] ss:$8 sps:$4 sm:$0xff]   ;;  %v2201_v28 = vld [vmem:[%s2390_s20 + $0x40] ss:$8 sps:$4 sm:$0xff]   ;;  %v2204_v30 = vld [vmem:[%s2390_s20 + $0x34] ss:$8 sps:$4 sm:$0xff]  }
  0x17   : > { %v2206_v33 = vld [vmem:[%s2385_s17 + $0x30] ss:$8 sps:$4 sm:$0xff]   ;;  %v2208_v35 = vld [vmem:[%s2385_s17 + $0x24] ss:$8 sps:$4 sm:$0xff]   ;;  %v2212_v39 = vld [vmem:[%s2385_s17 + $0x20] ss:$8 sps:$4 sm:$0xff]  }
  0x18   : > { %639 = vmatpush1.bf16.msra.mxu0 %v2188_v15  ;;  %1024 = vmatpush1.bf16.msra.mxu1 %v2189_v16  ;;  %v2207_v34 = vld [vmem:[%s2390_s20 + $0x30] ss:$8 sps:$4 sm:$0xff]   ;;  %v2210_v36 = vld [vmem:[%s2390_s20 + $0x24] ss:$8 sps:$4 sm:$0xff]   ;;  %v2213_v40 = vld [vmem:[%s2390_s20 + $0x20] ss:$8 sps:$4 sm:$0xff]  }
  0x19   : > { %640 = vmatprep.subr.bf16.mxu0 %v2190_v17  ;;  %1025 = vmatprep.subr.bf16.mxu1 %v2192_v18  ;;  %v1565_v37 = vld [vmem:[%s2998_s5 + $0x8] sm:$0xff]  ;;  %v1564_v38 = vld [vmem:[%s2998_s5] sm:$0xff]  ;;  %v2214_v41 = vld [vmem:[%s2385_s17 + $0x14] ss:$8 sps:$4 sm:$0xff]  }
  0x1a   : > { %1295 = vperm.xlu1 %2177, %v1231_v12   ;;  %1290 = vperm.xlu0 %2176, %v1230_v13   ;;  %v2216_v42 = vld [vmem:[%s2390_s20 + $0x14] ss:$8 sps:$4 sm:$0xff]   ;;  %v2218_v45 = vld [vmem:[%s2385_s17 + $0x10] ss:$8 sps:$4 sm:$0xff]   ;;  %v2220_v47 = vld [vmem:[%s2385_s17 + $0x4] ss:$8 sps:$4 sm:$0xff]  }
  0x1b   : > { %v1566_v44 = vld [vmem:[%s2998_s5 + $0x10] sm:$0xff]  ;;  %v2222_v48 = vld [vmem:[%s2390_s20 + $0x4] ss:$8 sps:$4 sm:$0xff]   ;;  %v2224_v51 = vld [vmem:[%s2385_s17] ss:$8 sps:$4 sm:$0xff]  }
  0x1c   : > { %641 = vmatpush1.bf16.msra.mxu0 %v2194_v21  ;;  %1026 = vmatpush1.bf16.msra.mxu1 %v2195_v22  ;;  %v2219_v46 = vld [vmem:[%s2390_s20 + $0x10] ss:$8 sps:$4 sm:$0xff]   ;;  %v1569_v49 = vld [vmem:[%s2998_s5 + $0x28] sm:$0xff]  ;;  %v1568_v50 = vld [vmem:[%s2998_s5 + $0x20] sm:$0xff] }
  0x1d   : > { %642 = vmatprep.subr.bf16.mxu0 %v2196_v23  ;;  %1027 = vmatprep.subr.bf16.mxu1 %v2198_v24  ;;  %v2225_v52 = vld [vmem:[%s2390_s20] ss:$8 sps:$4 sm:$0xff]   ;;  %v1571_v55 = vld [vmem:[%s2998_s5 + $0x38] sm:$0xff]  ;;  %v1570_v56 = vld [vmem:[%s2998_s5 + $0x30] sm:$0xff] }
  0x1e   : > { %1305 = vperm.xlu1 %2177, %v1233_v19   ;;  %1300 = vperm.xlu0 %2176, %v1232_v20   ;;  %v2226_v53 = vld [vmem:[%s2996_s3] sm:$0xff]   ;;  %v1573_v57 = vld [vmem:[%s2998_s5 + $0x48] sm:$0xff]  ;;  %v1575_v61 = vld [vmem:[%s2998_s5 + $0x58] sm:$0xff] }
  0x1f   : > { %v2227_v54 = vld [vmem:[%s2995_s2] sm:$0xff]   ;;  %v2228_v59 = vld [vmem:[%s2996_s3 + $0x8] sm:$0xff]   ;;  %v1574_v62 = vld [vmem:[%s2998_s5 + $0x50] sm:$0xff] }
  0x20   : > { %643 = vmatpush1.bf16.msra.mxu0 %v2200_v27  ;;  %1028 = vmatpush1.bf16.msra.mxu1 %v2201_v28  ;;  %v1572_v58 = vld [vmem:[%s2998_s5 + $0x40] sm:$0xff]  ;;  %v2229_v60 = vld [vmem:[%s2995_s2 + $0x8] sm:$0xff]   ;;  %v1238_v0 = vld [vmem:[%s2997_s4 + $0x70] sm:$0xff] }
  0x21   : > { %644 = vmatprep.subr.bf16.mxu0 %v2202_v29  ;;  %1029 = vmatprep.subr.bf16.mxu1 %v2204_v30  ;;  %v1576_v63 = vld [vmem:[%s2998_s5 + $0x60] sm:$0xff]  ;;  %v2230_v1 = vld [vmem:[%s2996_s3 + $0x10] sm:$0xff]   ;;  %v1577_v4 = vld [vmem:[%s2998_s5 + $0x68] sm:$0xff] }
  0x22   : > { %1315 = vperm.xlu1 %2177, %v1235_v25   ;;  %1310 = vperm.xlu0 %2176, %v1234_v26   ;;  %v2231_v3 = vld [vmem:[%s2995_s2 + $0x10] sm:$0xff]   ;;  %v1239_v5 = vld [vmem:[%s2997_s4 + $0x78] sm:$0xff]  ;;  %v1240_v7 = vld [vmem:[%s2997_s4 + $0x80] sm:$0xff] }
  0x23   : > { %v1578_v6 = vld [vmem:[%s2998_s5 + $0x70] sm:$0xff]  ;;  %v2232_v8 = vld [vmem:[%s2996_s3 + $0x18] sm:$0xff]   ;;  %v1241_v11 = vld [vmem:[%s2997_s4 + $0x88] sm:$0xff] }
  0x24   : > { %645 = vmatpush1.bf16.msra.mxu0 %v2206_v33  ;;  %1030 = vmatpush1.bf16.msra.mxu1 %v2207_v34  ;;  %v2233_v9 = vld [vmem:[%s2995_s2 + $0x18] sm:$0xff]   ;;  %v1580_v12 = vld [vmem:[%s2998_s5 + $0x80] sm:$0xff]  ;;  %v1242_v13 = vld [vmem:[%s2997_s4 + $0x90] sm:$0xff] }
  0x25   : > { %646 = vmatprep.subr.bf16.mxu0 %v2208_v35  ;;  %1031 = vmatprep.subr.bf16.mxu1 %v2210_v36  ;;  %v1579_v10 = vld [vmem:[%s2998_s5 + $0x78] sm:$0xff]  ;;  %v2234_v14 = vld [vmem:[%s2996_s3 + $0x20] sm:$0xff]   ;;  %v1581_v16 = vld [vmem:[%s2998_s5 + $0x88] sm:$0xff] }
  0x26   : > { %1325 = vperm.xlu1 %2177, %v1237_v31   ;;  %1320 = vperm.xlu0 %2176, %v1236_v32   ;;  %v2235_v15 = vld [vmem:[%s2995_s2 + $0x20] sm:$0xff]   ;;  %v1243_v17 = vld [vmem:[%s2997_s4 + $0x98] sm:$0xff]  ;;  %v1582_v18 = vld [vmem:[%s2998_s5 + $0x90] sm:$0xff] }
  0x27   : > { %v1244_v19 = vld [vmem:[%s2997_s4 + $0xa0] sm:$0xff]  ;;  %v2236_v20 = vld [vmem:[%s2996_s3 + $0x28] sm:$0xff]   ;;  %v1583_v22 = vld [vmem:[%s2998_s5 + $0x98] sm:$0xff] }
  0x28   : > { %647 = vmatpush1.bf16.msra.mxu0 %v2212_v39  ;;  %1032 = vmatpush1.bf16.msra.mxu1 %v2213_v40  ;;  %v2237_v21 = vld [vmem:[%s2995_s2 + $0x28] sm:$0xff]   ;;  %v1584_v24 = vld [vmem:[%s2998_s5 + $0xa0] sm:$0xff]  ;;  %v1246_v25 = vld [vmem:[%s2997_s4 + $0xb0] sm:$0xff] }
  0x29   : > { %648 = vmatprep.subr.bf16.mxu0 %v2214_v41  ;;  %1033 = vmatprep.subr.bf16.mxu1 %v2216_v42  ;;  %v1245_v23 = vld [vmem:[%s2997_s4 + $0xa8] sm:$0xff]  ;;  %v2238_v26 = vld [vmem:[%s2996_s3 + $0x30] sm:$0xff]   ;;  %v1247_v29 = vld [vmem:[%s2997_s4 + $0xb8] sm:$0xff] }
  0x2a   : > { %1605 = vperm.xlu1 %2177, %v1565_v37   ;;  %1600 = vperm.xlu0 %2176, %v1564_v38   ;;  %v2239_v27 = vld [vmem:[%s2995_s2 + $0x30] sm:$0xff]   ;;  %v1585_v28 = vld [vmem:[%s2998_s5 + $0xa8] sm:$0xff]  ;;  %v1248_v31 = vld [vmem:[%s2997_s4 + $0xc0] sm:$0xff] }
  0x2b   : > { %v1586_v30 = vld [vmem:[%s2998_s5 + $0xb0] sm:$0xff]  ;;  %v2240_v32 = vld [vmem:[%s2996_s3 + $0x38] sm:$0xff]   ;;  %v1249_v35 = vld [vmem:[%s2997_s4 + $0xc8] sm:$0xff] }
  0x2c   : > { %649 = vmatpush1.bf16.msra.mxu0 %v2218_v45  ;;  %1034 = vmatpush1.bf16.msra.mxu1 %v2219_v46  ;;  %v2241_v33 = vld [vmem:[%s2995_s2 + $0x38] sm:$0xff]   ;;  %v1588_v36 = vld [vmem:[%s2998_s5 + $0xc0] sm:$0xff]  ;;  %v1250_v37 = vld [vmem:[%s2997_s4 + $0xd0] sm:$0xff] }
  0x2d   : > { %650 = vmatprep.subr.bf16.mxu0 %v2220_v47  ;;  %1035 = vmatprep.subr.bf16.mxu1 %v2222_v48  ;;  %v1587_v34 = vld [vmem:[%s2998_s5 + $0xb8] sm:$0xff]  ;;  %v2242_v38 = vld [vmem:[%s2996_s3 + $0x40] sm:$0xff]   ;;  %v1589_v40 = vld [vmem:[%s2998_s5 + $0xc8] sm:$0xff] }
  0x2e   : > { %1615 = vperm.xlu1 %2177, %v1567_v43   ;;  %1610 = vperm.xlu0 %2176, %v1566_v44   ;;  %v2243_v39 = vld [vmem:[%s2995_s2 + $0x40] sm:$0xff]   ;;  %v1251_v41 = vld [vmem:[%s2997_s4 + $0xd8] sm:$0xff]  ;;  %v1590_v42 = vld [vmem:[%s2998_s5 + $0xd0] sm:$0xff] }
  0x2f   : > { %v1252_v43 = vld [vmem:[%s2997_s4 + $0xe0] sm:$0xff]  ;;  %v2244_v44 = vld [vmem:[%s2996_s3 + $0x48] sm:$0xff]   ;;  %v1591_v46 = vld [vmem:[%s2998_s5 + $0xd8] sm:$0xff] }
  0x30   : > { %651 = vmatpush1.bf16.msra.mxu0 %v2224_v51  ;;  %1036 = vmatpush1.bf16.msra.mxu1 %v2225_v52  ;;  %v2245_v45 = vld [vmem:[%s2995_s2 + $0x48] sm:$0xff]   ;;  %v1592_v48 = vld [vmem:[%s2998_s5 + $0xe0] sm:$0xff]  ;;  %v2247_v51 = vld [vmem:[%s2995_s2 + $0x50] sm:$0xff]  }
  0x31   : > { %v1253_v47 = vld [vmem:[%s2997_s4 + $0xe8] sm:$0xff] }
  0x32   : > { %1625 = vperm.xlu1 %2177, %v1569_v49   ;;  %1620 = vperm.xlu0 %2176, %v1568_v50   ;;  %v1254_v49 = vld [vmem:[%s2997_s4 + $0xf0] sm:$0xff]  ;;  %v1593_v52 = vld [vmem:[%s2998_s5 + $0xe8] sm:$0xff] }
  0x33   : > { %669 = vmatmul.mubr.bf16.vlgmr.msra.gmra.mxu0 %v2226_v53  ;;  %1054 = vmatmul.mubr.bf16.vlgmr.msra.gmra.mxu1 %v2227_v54  ;;  %v2246_v50 = vld [vmem:[%s2996_s3 + $0x50] sm:$0xff]   ;;  %v1255_v53 = vld [vmem:[%s2997_s4 + $0xf8] sm:$0xff] }
  0x34   : > { %678 = vmatprep.mubr.bf16.mxu0 %v2300_v2  ;;  %1063 = vmatprep.mubr.bf16.mxu1 %v2300_v2  ;;  %v1594_v54 = vld [vmem:[%s2998_s5 + $0xf0] sm:$0xff] }
  0x36   : > { %1635 = vperm.xlu1 %2177, %v1571_v55   ;;  %1630 = vperm.xlu0 %2176, %v1570_v56   ;;  %v1256_v55 = vld [vmem:[%s2997_s4 + $0x100] sm:$0xff]  ;;  %v2248_v56 = vld [vmem:[%s2996_s3 + $0x58] sm:$0xff]  }
  0x3a   : > { %1645 = vperm.xlu1 %2177, %v1573_v57   ;;  %1640 = vperm.xlu0 %2176, %v1572_v58   ;;  %v2249_v57 = vld [vmem:[%s2995_s2 + $0x58] sm:$0xff]  }
  0x3b   : > { %679 = vmatmul.mubr.bf16.gmra.mxu0 %v2228_v59  ;;  %1064 = vmatmul.mubr.bf16.gmra.mxu1 %v2229_v60  ;;  %v1595_v58 = vld [vmem:[%s2998_s5 + $0xf8] sm:$0xff]  ;;  %v1257_v59 = vld [vmem:[%s2997_s4 + $0x108] sm:$0xff] }
  0x3c   : > { %688 = vmatprep.mubr.bf16.mxu0 %v2300_v2  ;;  %1073 = vmatprep.mubr.bf16.mxu1 %v2300_v2  ;;  %v1597_v60 = vld [vmem:[%s2998_s5 + $0x108] sm:$0xff] }
  0x3e   : > { %1655 = vperm.xlu1 %2177, %v1575_v61   ;;  %1650 = vperm.xlu0 %2176, %v1574_v62   ;;  %v1596_v61 = vld [vmem:[%s2998_s5 + $0x100] sm:$0xff] }
  0x3f   : > { %v2250_v62 = vld [vmem:[%s2996_s3 + $0x60] sm:$0xff]  }
  0x42   : > { %1660 = vperm.xlu1 %2177, %v1576_v63   ;;  %1330 = vperm.xlu0 %2176, %v1238_v0   ;;  %v2251_v63 = vld [vmem:[%s2995_s2 + $0x60] sm:$0xff]   ;;  %v2252_v0 = vld [vmem:[%s2996_s3 + $0x68] sm:$0xff]  }
  0x43   : > { %689 = vmatmul.mubr.bf16.gmra.mxu0 %v2230_v1  ;;  %1074 = vmatmul.mubr.bf16.gmra.mxu1 %v2231_v3  ;;  %v2253_v1 = vld [vmem:[%s2995_s2 + $0x68] sm:$0xff]   ;;  %v2254_v3 = vld [vmem:[%s2996_s3 + $0x70] sm:$0xff]  }
  0x44   : > { %698 = vmatprep.mubr.bf16.mxu0 %v2300_v2  ;;  %1083 = vmatprep.mubr.bf16.mxu1 %v2300_v2 }
  0x46   : > { %1665 = vperm.xlu1 %2177, %v1577_v4   ;;  %1335 = vperm.xlu0 %2176, %v1239_v5   ;;  %v2255_v4 = vld [vmem:[%s2995_s2 + $0x70] sm:$0xff]   ;;  %v2256_v5 = vld [vmem:[%s2996_s3 + $0x78] sm:$0xff]  }
  0x4a   : > { %1670 = vperm.xlu1 %2177, %v1578_v6   ;;  %1340 = vperm.xlu0 %2176, %v1240_v7   ;;  %v2257_v6 = vld [vmem:[%s2995_s2 + $0x78] sm:$0xff]   ;;  %v2258_v7 = vld [vmem:[%s2996_s3 + $0x80] sm:$0xff]  }
  0x4b   : > { %699 = vmatmul.mubr.bf16.gmra.mxu0 %v2232_v8  ;;  %1084 = vmatmul.mubr.bf16.gmra.mxu1 %v2233_v9  ;;  %v2259_v8 = vld [vmem:[%s2995_s2 + $0x80] sm:$0xff]  }
  0x4c   : > { %708 = vmatprep.mubr.bf16.mxu0 %v2300_v2  ;;  %1093 = vmatprep.mubr.bf16.mxu1 %v2300_v2 }
  0x4e   : > { %1675 = vperm.xlu1 %2177, %v1579_v10   ;;  %1345 = vperm.xlu0 %2176, %v1241_v11  }
  0x52   : > { %1680 = vperm.xlu1 %2177, %v1580_v12   ;;  %1350 = vperm.xlu0 %2176, %v1242_v13  }
  0x53   : > { %709 = vmatmul.mubr.bf16.gmra.mxu0 %v2234_v14  ;;  %1094 = vmatmul.mubr.bf16.gmra.mxu1 %v2235_v15 }
  0x54   : > { %718 = vmatprep.mubr.bf16.mxu0 %v2300_v2  ;;  %1103 = vmatprep.mubr.bf16.mxu1 %v2300_v2 }
  0x56   : > { %1685 = vperm.xlu1 %2177, %v1581_v16   ;;  %1355 = vperm.xlu0 %2176, %v1243_v17  }
  0x5a   : > { %1690 = vperm.xlu1 %2177, %v1582_v18   ;;  %1360 = vperm.xlu0 %2176, %v1244_v19  }
  0x5b   : > { %719 = vmatmul.mubr.bf16.gmra.mxu0 %v2236_v20  ;;  %1104 = vmatmul.mubr.bf16.gmra.mxu1 %v2237_v21 }
  0x5c   : > { %728 = vmatprep.mubr.bf16.mxu0 %v2300_v2  ;;  %1113 = vmatprep.mubr.bf16.mxu1 %v2300_v2 }
  0x5e   : > { %1695 = vperm.xlu1 %2177, %v1583_v22   ;;  %1365 = vperm.xlu0 %2176, %v1245_v23  }
  0x62   : > { %1700 = vperm.xlu1 %2177, %v1584_v24   ;;  %1370 = vperm.xlu0 %2176, %v1246_v25  }
  0x63   : > { %729 = vmatmul.mubr.bf16.gmra.mxu0 %v2238_v26  ;;  %1114 = vmatmul.mubr.bf16.gmra.mxu1 %v2239_v27 }
  0x64   : > { %738 = vmatprep.mubr.bf16.mxu0 %v2300_v2  ;;  %1123 = vmatprep.mubr.bf16.mxu1 %v2300_v2 }
  0x66   : > { %1705 = vperm.xlu1 %2177, %v1585_v28   ;;  %1375 = vperm.xlu0 %2176, %v1247_v29  }
  0x6a   : > { %1710 = vperm.xlu1 %2177, %v1586_v30   ;;  %1380 = vperm.xlu0 %2176, %v1248_v31  }
  0x6b   : > { %739 = vmatmul.mubr.bf16.gmra.mxu0 %v2240_v32  ;;  %1124 = vmatmul.mubr.bf16.gmra.mxu1 %v2241_v33 }
  0x6c   : > { %748 = vmatprep.mubr.bf16.mxu0 %v2300_v2  ;;  %1133 = vmatprep.mubr.bf16.mxu1 %v2300_v2 }
  0x6e   : > { %1715 = vperm.xlu1 %2177, %v1587_v34   ;;  %1385 = vperm.xlu0 %2176, %v1249_v35  }
  0x72   : > { %1720 = vperm.xlu1 %2177, %v1588_v36   ;;  %1390 = vperm.xlu0 %2176, %v1250_v37  }
  0x73   : > { %749 = vmatmul.mubr.bf16.gmra.mxu0 %v2242_v38  ;;  %1134 = vmatmul.mubr.bf16.gmra.mxu1 %v2243_v39 }
  0x74   : > { %758 = vmatprep.mubr.bf16.mxu0 %v2300_v2  ;;  %1143 = vmatprep.mubr.bf16.mxu1 %v2300_v2 }
  0x76   : > { %1725 = vperm.xlu1 %2177, %v1589_v40   ;;  %1395 = vperm.xlu0 %2176, %v1251_v41  }
  0x7a   : > { %1730 = vperm.xlu1 %2177, %v1590_v42   ;;  %1400 = vperm.xlu0 %2176, %v1252_v43  }
  0x7b   : > { %759 = vmatmul.mubr.bf16.gmra.mxu0 %v2244_v44  ;;  %1144 = vmatmul.mubr.bf16.gmra.mxu1 %v2245_v45 }
  0x7c   : > { %768 = vmatprep.mubr.bf16.mxu0 %v2300_v2  ;;  %1153 = vmatprep.mubr.bf16.mxu1 %v2300_v2 }
  0x7e   : > { %1735 = vperm.xlu1 %2177, %v1591_v46   ;;  %1405 = vperm.xlu0 %2176, %v1253_v47  }
  0x82   : > { %1740 = vperm.xlu1 %2177, %v1592_v48   ;;  %1410 = vperm.xlu0 %2176, %v1254_v49  }
  0x83   : > { %769 = vmatmul.mubr.bf16.gmra.mxu0 %v2246_v50  ;;  %1154 = vmatmul.mubr.bf16.gmra.mxu1 %v2247_v51 }
  0x84   : > { %778 = vmatprep.mubr.bf16.mxu0 %v2300_v2  ;;  %1163 = vmatprep.mubr.bf16.mxu1 %v2300_v2 }
  0x86   : > { %1745 = vperm.xlu1 %2177, %v1593_v52   ;;  %1415 = vperm.xlu0 %2176, %v1255_v53  }
  0x89   : > { %v1261_v9 = vpop.permute.xlu0 %1260  ;;  %v1271_v10 = vpop.permute.xlu1 %1270 }
  0x8a   : > { %1750 = vperm.xlu1 %2177, %v1594_v54   ;;  %1420 = vperm.xlu0 %2176, %v1256_v55  }
  0x8b   : > { %779 = vmatmul.mubr.bf16.gmra.mxu0 %v2248_v56  ;;  %1164 = vmatmul.mubr.bf16.gmra.mxu1 %v2249_v57 }
  0x8c   : > { %788 = vmatprep.mubr.bf16.mxu0 %v2300_v2  ;;  %1173 = vmatprep.mubr.bf16.mxu1 %v2300_v2 }
  0x8d   : > { %v1266_v11 = vpop.permute.xlu0 %1265  ;;  %v2750_v12 = vpop.permute.xlu1 %1275 }
  0x8e   : > { %1755 = vperm.xlu1 %2177, %v1595_v58   ;;  %1425 = vperm.xlu0 %2176, %v1257_v59  }
  0x91   : > { %v2752_v13 = vpop.permute.xlu0 %1280  ;;  %v2754_v14 = vpop.permute.xlu1 %1285 }
  0x92   : > { %1765 = vperm.xlu1 %2177, %v1597_v60   ;;  %1760 = vperm.xlu0 %2176, %v1596_v61  }
  0x93   : > { %789 = vmatmul.mubr.bf16.gmra.mxu0 %v2250_v62  ;;  %1174 = vmatmul.mubr.bf16.gmra.mxu1 %v2251_v63 }
  0x94   : > { %798 = vmatprep.mubr.bf16.mxu0 %v2300_v2  ;;  %1183 = vmatprep.mubr.bf16.mxu1 %v2300_v2 }
  0x95   : > { %v2758_v15 = vpop.permute.xlu1 %1295 }
  0x99   : > { %v2762_v17 = vpop.permute.xlu1 %1305 }
  0x9b   : > { %799 = vmatmul.mubr.bf16.gmra.mxu0 %v2252_v0  ;;  %1184 = vmatmul.mubr.bf16.gmra.mxu1 %v2253_v1 }
  0x9c   : > { %808 = vmatprep.mubr.bf16.mxu0 %v2300_v2  ;;  %1193 = vmatprep.mubr.bf16.mxu1 %v2300_v2 }
  0x9d   : > { %v2766_v19 = vpop.permute.xlu1 %1315 }
  0xa1   : > { %v2770_v21 = vpop.permute.xlu1 %1325 }
  0xa3   : > { %809 = vmatmul.mubr.bf16.gmra.mxu0 %v2254_v3  ;;  %1194 = vmatmul.mubr.bf16.gmra.mxu1 %v2255_v4 }
  0xa4   : > { %818 = vmatprep.mubr.bf16.mxu0 %v2300_v2  ;;  %1203 = vmatprep.mubr.bf16.mxu1 %v2300_v2 }
  0xa5   : > { %v1606_v23 = vpop.permute.xlu1 %1605 }
  0xa9   : > { %v2772_v25 = vpop.permute.xlu1 %1615 }
  0xab   : > { %819 = vmatmul.mubr.bf16.gmra.mxu0 %v2256_v5  ;;  %1204 = vmatmul.mubr.bf16.gmra.mxu1 %v2257_v6 }
  0xac   : > { %828 = vmatprep.mubr.bf16.mxu0 %v2300_v2  ;;  %1213 = vmatprep.mubr.bf16.mxu1 %v2300_v2  ;;  %v2756_v2 = vpop.permute.xlu0 %1290 }
  0xad   : > { %v2776_v27 = vpop.permute.xlu1 %1625 }
  0xb0   : > { %v2760_v16 = vpop.permute.xlu0 %1300 }
  0xb1   : > { %v2780_v31 = vpop.permute.xlu1 %1635 }
  0xb3   : > { %829 = vmatmul.mubr.bf16.gmra.mxu0 %v2258_v7  ;;  %1214 = vmatmul.mubr.bf16.gmra.mxu1 %v2259_v8 }
  0xb4   : > { %v2764_v18 = vpop.permute.xlu0 %1310 }
  0xb5   : > { %v2784_v45 = vpop.permute.xlu1 %1645 }
  0xb8   : > { %v2768_v20 = vpop.permute.xlu0 %1320 }
  0xb9   : > { %v2788_v1 = vpop.permute.xlu1 %1655 }
  0xbc   : > { %v1601_v22 = vpop.permute.xlu0 %1600 }
  0xc0   : > { %v1611_v24 = vpop.permute.xlu0 %1610 }
  0xc4   : > { %v2774_v26 = vpop.permute.xlu0 %1620 }
  0xc8   : > { %v2778_v28 = vpop.permute.xlu0 %1630 }
  0xcc   : > { %v2782_v35 = vpop.permute.xlu0 %1640 }
  0xd0   : > { %v2786_v51 = vpop.permute.xlu0 %1650 }
  0xf3   : > { %v670_v29 = vpop.f32.mrf.mxu0  ;;  %v1055_v30 = vpop.f32.mrf.mxu1 }
  0xf4   : > { %v1056_v32 = vadd.f32 %v1055_v30, %v670_v29 }
  0xf5   : > { %v672_v33 = vpop.f32.mrf.mxu0  ;;  %v1057_v34 = vpop.f32.mrf.mxu1 }
  0xf6   : > { %v1428_v36 = vadd.f32 %v1261_v9, %v1056_v32  ;;  %v1058_v37 = vadd.f32 %v1057_v34, %v672_v33 }
  0xf7   : > { %v674_v38 = vpop.f32.mrf.mxu0  ;;  %v1059_v39 = vpop.f32.mrf.mxu1 }
  0xf8   : > { %v1429_v40 = vadd.f32 %v1261_v9, %v1058_v37  ;;  %v1060_v41 = vadd.f32 %v1059_v39, %v674_v38  ;;  %v1496_v42 = vmax.f32 %v1428_v36, 0.0 }
  0xf9   : > { %v676_v43 = vpop.f32.mrf.mxu0  ;;  %v1061_v44 = vpop.f32.mrf.mxu1 }
  0xfa   : > { %v1430_v46 = vadd.f32 %v1266_v11, %v1060_v41  ;;  %v1062_v47 = vadd.f32 %v1061_v44, %v676_v43  ;;  %v1497_v48 = vmax.f32 %v1429_v40, 0.0  ;;  %v1768_v55 = vmul.f32 %v1601_v22, %v1496_v42  ;;  %v2794_v42 = vpop.permute.xlu1 %1660 }
  0xfb   : > { %v680_v49 = vpop.f32.mrf.mxu0  ;;  %v1065_v50 = vpop.f32.mrf.mxu1 }
  0xfc   : > { %v1498_v52 = vmax.f32 %v1430_v46, 0.0  ;;  %v1431_v53 = vadd.f32 %v1266_v11, %v1062_v47  ;;  %v1066_v54 = vadd.f32 %v1065_v50, %v680_v49  ;;  %v1769_v62 = vmul.f32 %v1601_v22, %v1497_v48  ;;  %v2790_v11 = vpop.permute.xlu0 %1330 }
  0xfd   : > { %v682_v56 = vpop.f32.mrf.mxu0  ;;  %v1067_v57 = vpop.f32.mrf.mxu1 }
  0xfe   : > { %v1770_v58 = vmul.f32 %v1606_v23, %v1498_v52  ;;  %v1499_v59 = vmax.f32 %v1431_v53, 0.0  ;;  %v1432_v60 = vadd.f32 %v1271_v10, %v1066_v54  ;;  %v1068_v61 = vadd.f32 %v1067_v57, %v682_v56 }
  0xff   : > { %v684_v63 = vpop.f32.mrf.mxu0  ;;  %v1069_v0 = vpop.f32.mrf.mxu1 }
 0x100   : > { %v1836_v3 = vadd.f32 %v1770_v58, %v1768_v55  ;;  %v1771_v4 = vmul.f32 %v1606_v23, %v1499_v59  ;;  %v1500_v5 = vmax.f32 %v1432_v60, 0.0  ;;  %v1433_v6 = vadd.f32 %v1271_v10, %v1068_v61  ;;  %v2798_v52 = vpop.permute.xlu0 %1335 }
 0x101   : > { %v1070_v7 = vadd.f32 %v1069_v0, %v684_v63  ;;  %v686_v8 = vpop.f32.mrf.mxu0  ;;  %v1071_v9 = vpop.f32.mrf.mxu1 }
 0x102   : > { %v1875_v29 = vadd.f32 %v1771_v4, %v1769_v62  ;;  %v1772_v30 = vmul.f32 %v1611_v24, %v1500_v5  ;;  %v1501_v32 = vmax.f32 %v1433_v6, 0.0  ;;  %v1072_v33 = vadd.f32 %v1071_v9, %v686_v8 }
 0x103   : > { %v1434_v34 = vadd.f32 %v2750_v12, %v1070_v7  ;;  %v690_v22 = vpop.f32.mrf.mxu0  ;;  %v1075_v36 = vpop.f32.mrf.mxu1 }
 0x104   : > { %v1837_v37 = vadd.f32 %v1836_v3, %v1772_v30  ;;  %v1773_v38 = vmul.f32 %v1611_v24, %v1501_v32  ;;  %v1435_v39 = vadd.f32 %v2750_v12, %v1072_v33  ;;  %v1076_v23 = vadd.f32 %v1075_v36, %v690_v22  ;;  %v2804_v3 = vpop.permute.xlu1 %1665  ;;  %v2808_v9 = vpop.permute.xlu0 %1340 }
 0x105   : > { %v1502_v40 = vmax.f32 %v1434_v34, 0.0  ;;  %v692_v10 = vpop.f32.mrf.mxu0  ;;  %v1077_v41 = vpop.f32.mrf.mxu1 }
 0x106   : > { %v1876_v43 = vadd.f32 %v1875_v29, %v1773_v38  ;;  %v1503_v44 = vmax.f32 %v1435_v39, 0.0  ;;  %v1436_v46 = vadd.f32 %v2752_v13, %v1076_v23  ;;  %v1078_v47 = vadd.f32 %v1077_v41, %v692_v10 }
 0x107   : > { %v1774_v48 = vmul.f32 %v2772_v25, %v1502_v40  ;;  %v694_v49 = vpop.f32.mrf.mxu0  ;;  %v1079_v50 = vpop.f32.mrf.mxu1 }
 0x108   : > { %v1775_v24 = vmul.f32 %v2772_v25, %v1503_v44  ;;  %v1504_v12 = vmax.f32 %v1436_v46, 0.0  ;;  %v1437_v53 = vadd.f32 %v2752_v13, %v1078_v47  ;;  %v1080_v54 = vadd.f32 %v1079_v50, %v694_v49  ;;  %v2814_v10 = vpop.permute.xlu1 %1670  ;;  %v2818_v50 = vpop.permute.xlu0 %1345 }
 0x109   : > { %v1838_v55 = vadd.f32 %v1837_v37, %v1774_v48  ;;  %v696_v56 = vpop.f32.mrf.mxu0  ;;  %v1081_v57 = vpop.f32.mrf.mxu1 }
 0x10a   : > { %v1877_v58 = vadd.f32 %v1876_v43, %v1775_v24  ;;  %v1776_v59 = vmul.f32 %v2774_v26, %v1504_v12  ;;  %v1505_v60 = vmax.f32 %v1437_v53, 0.0  ;;  %v1438_v61 = vadd.f32 %v2754_v14, %v1080_v54 }
 0x10b   : > { %v1082_v62 = vadd.f32 %v1081_v57, %v696_v56  ;;  %v700_v63 = vpop.f32.mrf.mxu0  ;;  %v1085_v0 = vpop.f32.mrf.mxu1 }
 0x10c   : > { %v1839_v4 = vadd.f32 %v1838_v55, %v1776_v59  ;;  %v1777_v25 = vmul.f32 %v2774_v26, %v1505_v60  ;;  %v1506_v5 = vmax.f32 %v1438_v61, 0.0  ;;  %v1086_v13 = vadd.f32 %v1085_v0, %v700_v63  ;;  %v2824_v63 = vpop.permute.xlu1 %1675 }
 0x10d   : > { %v1439_v6 = vadd.f32 %v2754_v14, %v1082_v62  ;;  %v702_v7 = vpop.f32.mrf.mxu0  ;;  %v1087_v8 = vpop.f32.mrf.mxu1 }
 0x10e   : > { %v1878_v29 = vadd.f32 %v1877_v58, %v1777_v25  ;;  %v1778_v30 = vmul.f32 %v2776_v27, %v1506_v5  ;;  %v1440_v32 = vadd.f32 %v2756_v2, %v1086_v13  ;;  %v1088_v33 = vadd.f32 %v1087_v8, %v702_v7 }
 0x10f   : > { %v1507_v34 = vmax.f32 %v1439_v6, 0.0  ;;  %v704_v22 = vpop.f32.mrf.mxu0  ;;  %v1089_v36 = vpop.f32.mrf.mxu1 }
 0x110   : > { %v1840_v37 = vadd.f32 %v1839_v4, %v1778_v30  ;;  %v1508_v38 = vmax.f32 %v1440_v32, 0.0  ;;  %v1441_v26 = vadd.f32 %v2756_v2, %v1088_v33  ;;  %v1090_v39 = vadd.f32 %v1089_v36, %v704_v22  ;;  %v2828_v6 = vpop.permute.xlu0 %1350 }
 0x111   : > { %v1779_v14 = vmul.f32 %v2776_v27, %v1507_v34  ;;  %v706_v23 = vpop.f32.mrf.mxu0  ;;  %v1091_v40 = vpop.f32.mrf.mxu1 }
 0x112   : > { %v1780_v41 = vmul.f32 %v2778_v28, %v1508_v38  ;;  %v1509_v43 = vmax.f32 %v1441_v26, 0.0  ;;  %v1442_v44 = vadd.f32 %v2758_v15, %v1090_v39  ;;  %v1092_v46 = vadd.f32 %v1091_v40, %v706_v23  ;;  %v2834_v39 = vpop.permute.xlu1 %1680 }
 0x113   : > { %v1879_v47 = vadd.f32 %v1878_v29, %v1779_v14  ;;  %v710_v48 = vpop.f32.mrf.mxu0  ;;  %v1095_v49 = vpop.f32.mrf.mxu1 }
 0x114   : > { %v1841_v24 = vadd.f32 %v1840_v37, %v1780_v41  ;;  %v1781_v2 = vmul.f32 %v2778_v28, %v1509_v43  ;;  %v1510_v12 = vmax.f32 %v1442_v44, 0.0  ;;  %v1443_v27 = vadd.f32 %v2758_v15, %v1092_v46 }
 0x115   : > { %v1096_v53 = vadd.f32 %v1095_v49, %v710_v48  ;;  %v712_v54 = vpop.f32.mrf.mxu0  ;;  %v1097_v55 = vpop.f32.mrf.mxu1 }
 0x116   : > { %v1880_v56 = vadd.f32 %v1879_v47, %v1781_v2  ;;  %v1782_v57 = vmul.f32 %v2780_v31, %v1510_v12  ;;  %v1511_v58 = vmax.f32 %v1443_v27, 0.0  ;;  %v1098_v59 = vadd.f32 %v1097_v55, %v712_v54  ;;  %v2838_v47 = vpop.permute.xlu0 %1355 }
 0x117   : > { %v1444_v60 = vadd.f32 %v2760_v16, %v1096_v53  ;;  %v714_v61 = vpop.f32.mrf.mxu0  ;;  %v1099_v62 = vpop.f32.mrf.mxu1 }
 0x118   : > { %v1842_v0 = vadd.f32 %v1841_v24, %v1782_v57  ;;  %v1783_v28 = vmul.f32 %v2780_v31, %v1511_v58  ;;  %v1445_v4 = vadd.f32 %v2760_v16, %v1098_v59  ;;  %v1100_v15 = vadd.f32 %v1099_v62, %v714_v61  ;;  %v2844_v59 = vpop.permute.xlu1 %1685 }
 0x119   : > { %v1512_v25 = vmax.f32 %v1444_v60, 0.0  ;;  %v716_v5 = vpop.f32.mrf.mxu0  ;;  %v1101_v13 = vpop.f32.mrf.mxu1 }
 0x11a   : > { %v1881_v7 = vadd.f32 %v1880_v56, %v1783_v28  ;;  %v1513_v8 = vmax.f32 %v1445_v4, 0.0  ;;  %v1446_v29 = vadd.f32 %v2762_v17, %v1100_v15  ;;  %v1102_v30 = vadd.f32 %v1101_v13, %v716_v5  ;;  %v2848_v4 = vpop.permute.xlu0 %1360 }
 0x11b   : > { %v1784_v32 = vmul.f32 %v2782_v35, %v1512_v25  ;;  %v720_v33 = vpop.f32.mrf.mxu0  ;;  %v1105_v34 = vpop.f32.mrf.mxu1 }
 0x11c   : > { %v1785_v22 = vmul.f32 %v2782_v35, %v1513_v8  ;;  %v1514_v31 = vmax.f32 %v1446_v29, 0.0  ;;  %v1447_v16 = vadd.f32 %v2762_v17, %v1102_v30  ;;  %v1106_v36 = vadd.f32 %v1105_v34, %v720_v33 }
 0x11d   : > { %v1843_v37 = vadd.f32 %v1842_v0, %v1784_v32  ;;  %v722_v38 = vpop.f32.mrf.mxu0  ;;  %v1107_v26 = vpop.f32.mrf.mxu1 }
 0x11e   : > { %v1882_v14 = vadd.f32 %v1881_v7, %v1785_v22  ;;  %v1786_v23 = vmul.f32 %v2784_v45, %v1514_v31  ;;  %v1515_v40 = vmax.f32 %v1447_v16, 0.0  ;;  %v1448_v41 = vadd.f32 %v2764_v18, %v1106_v36  ;;  %v2854_v31 = vpop.permute.xlu1 %1690 }
 0x11f   : > { %v1108_v43 = vadd.f32 %v1107_v26, %v722_v38  ;;  %v724_v44 = vpop.f32.mrf.mxu0  ;;  %v1109_v46 = vpop.f32.mrf.mxu1 }
 0x120   : > { %v1844_v35 = vadd.f32 %v1843_v37, %v1786_v23  ;;  %v1787_v17 = vmul.f32 %v2784_v45, %v1515_v40  ;;  %v1516_v48 = vmax.f32 %v1448_v41, 0.0  ;;  %v1110_v49 = vadd.f32 %v1109_v46, %v724_v44  ;;  %v2858_v40 = vpop.permute.xlu0 %1365 }
 0x121   : > { %v1449_v24 = vadd.f32 %v2764_v18, %v1108_v43  ;;  %v726_v2 = vpop.f32.mrf.mxu0  ;;  %v1111_v12 = vpop.f32.mrf.mxu1 }
 0x122   : > { %v1883_v27 = vadd.f32 %v1882_v14, %v1787_v17  ;;  %v1788_v53 = vmul.f32 %v2786_v51, %v1516_v48  ;;  %v1450_v54 = vadd.f32 %v2766_v19, %v1110_v49  ;;  %v1112_v55 = vadd.f32 %v1111_v12, %v726_v2  ;;  %v2863_v2 = vpop.permute.xlu1 %1695 }
 0x123   : > { %v1517_v56 = vmax.f32 %v1449_v24, 0.0  ;;  %v730_v57 = vpop.f32.mrf.mxu0  ;;  %v1115_v58 = vpop.f32.mrf.mxu1 }
 0x124   : > { %v1845_v60 = vadd.f32 %v1844_v35, %v1788_v53  ;;  %v1518_v61 = vmax.f32 %v1450_v54, 0.0  ;;  %v1451_v45 = vadd.f32 %v2766_v19, %v1112_v55  ;;  %v1116_v62 = vadd.f32 %v1115_v58, %v730_v57 }
 0x125   : > { %v1789_v18 = vmul.f32 %v2786_v51, %v1517_v56  ;;  %v732_v0 = vpop.f32.mrf.mxu0  ;;  %v1117_v28 = vpop.f32.mrf.mxu1 }
 0x126   : > { %v1790_v15 = vmul.f32 %v2788_v1, %v1518_v61  ;;  %v1519_v25 = vmax.f32 %v1451_v45, 0.0  ;;  %v1452_v5 = vadd.f32 %v2768_v20, %v1116_v62  ;;  %v1118_v13 = vadd.f32 %v1117_v28, %v732_v0 }
 0x127   : > { %v1884_v7 = vadd.f32 %v1883_v27, %v1789_v18  ;;  %v734_v8 = vpop.f32.mrf.mxu0  ;;  %v1119_v29 = vpop.f32.mrf.mxu1 }
 0x128   : > { %v1846_v30 = vadd.f32 %v1845_v60, %v1790_v15  ;;  %v1791_v32 = vmul.f32 %v2788_v1, %v1519_v25  ;;  %v1520_v19 = vmax.f32 %v1452_v5, 0.0  ;;  %v1453_v33 = vadd.f32 %v2768_v20, %v1118_v13  ;;  %v2872_v60 = vpop.permute.xlu1 %1700 }
 0x129   : > { %v1120_v51 = vadd.f32 %v1119_v29, %v734_v8  ;;  %v736_v34 = vpop.f32.mrf.mxu0  ;;  %v1121_v22 = vpop.f32.mrf.mxu1 }
 0x12a   : > { %v1885_v16 = vadd.f32 %v1884_v7, %v1791_v32  ;;  %v1792_v36 = vmul.f32 %v2794_v42, %v1520_v19  ;;  %v1521_v37 = vmax.f32 %v1453_v33, 0.0  ;;  %v1122_v38 = vadd.f32 %v1121_v22, %v736_v34 }
 0x12b   : > { %v1454_v26 = vadd.f32 %v2770_v21, %v1120_v51  ;;  %v740_v14 = vpop.f32.mrf.mxu0  ;;  %v1125_v23 = vpop.f32.mrf.mxu1 }
 0x12c   : > { %v1847_v1 = vadd.f32 %v1846_v30, %v1792_v36  ;;  %v1793_v41 = vmul.f32 %v2794_v42, %v1521_v37  ;;  %v1455_v20 = vadd.f32 %v2770_v21, %v1122_v38  ;;  %v2868_v42 = vpop.permute.xlu0 %1370  ;;  %v2876_v15 = vpop.permute.xlu1 %1705  ;;  %v1126_v34 = vadd.f32 %v1125_v23, %v740_v14 }
 0x12d   : > { %v1522_v43 = vmax.f32 %v1454_v26, 0.0  ;;  %v742_v44 = vpop.f32.mrf.mxu0  ;;  %v1127_v46 = vpop.f32.mrf.mxu1 }
 0x12e   : > { %v1886_v35 = vadd.f32 %v1885_v16, %v1793_v41  ;;  %v1523_v17 = vmax.f32 %v1455_v20, 0.0  ;;  %v1128_v22 = vadd.f32 %v1127_v46, %v742_v44  ;;  %v1456_v20 = vadd.f32 %v2790_v11, %v1126_v34 }
 0x12f   : > { %v1794_v48 = vmul.f32 %v2804_v3, %v1522_v43  ;;  %v744_v49 = vpop.f32.mrf.mxu0  ;;  %v1129_v24 = vpop.f32.mrf.mxu1 }
 0x130   : > { %v1795_v12 = vmul.f32 %v2804_v3, %v1523_v17  ;;  %v2874_v62 = vpop.permute.xlu0 %1375  ;;  %v2880_v32 = vpop.permute.xlu1 %1710  ;;  %v1130_v37 = vadd.f32 %v1129_v24, %v744_v49  ;;  %v1457_v43 = vadd.f32 %v2790_v11, %v1128_v22  ;;  %v1524_v49 = vmax.f32 %v1456_v20, 0.0 }
 0x131   : > { %v2866_v27 = vadd.f32 %v1847_v1, %v1794_v48  ;;  %v746_v53 = vpop.f32.mrf.mxu0  ;;  %v1131_v54 = vpop.f32.mrf.mxu1  ;;  %3004 = vst [vmem:[#allocation3_spill] sm:$0xff] %v2880_v32 }
 0x132   : > { %v2870_v21 = vadd.f32 %v1886_v35, %v1795_v12  ;;  %v1132_v38 = vadd.f32 %v1131_v54, %v746_v53  ;;  %v1458_v14 = vadd.f32 %v2798_v52, %v1130_v37  ;;  %v1525_v54 = vmax.f32 %v1457_v43, 0.0 }
 0x133   : > { %v750_v55 = vpop.f32.mrf.mxu0  ;;  %v1135_v56 = vpop.f32.mrf.mxu1 }
 0x134   : > { %v2878_v13 = vpop.permute.xlu0 %1380  ;;  %v2884_v41 = vpop.permute.xlu1 %1715  ;;  %v1136_v12 = vadd.f32 %v1135_v56, %v750_v55  ;;  %v1459_v23 = vadd.f32 %v2798_v52, %v1132_v38  ;;  %v1526_v56 = vmax.f32 %v1458_v14, 0.0 }
 0x135   : > { %v752_v57 = vpop.f32.mrf.mxu0  ;;  %v1137_v58 = vpop.f32.mrf.mxu1  ;;  %3006 = vst [vmem:[#allocation5_spill] sm:$0xff] %v2884_v41 }
 0x136   : > { %v1460_v11 = vadd.f32 %v2808_v9, %v1136_v12 }
 0x137   : > { %v754_v61 = vpop.f32.mrf.mxu0  ;;  %v1139_v45 = vpop.f32.mrf.mxu1 }
 0x138   : > { %v2882_v51 = vpop.permute.xlu0 %1385  ;;  %v1140_v24 = vadd.f32 %v1139_v45, %v754_v61  ;;  %v2892_v32 = vpop.permute.xlu1 %1720  ;;  %v1796_v61 = vmul.f32 %v2814_v10, %v1524_v49 }
 0x139   : > { %v756_v18 = vpop.f32.mrf.mxu0  ;;  %v1141_v3 = vpop.f32.mrf.mxu1  ;;  %3005 = vst [vmem:[#allocation4_spill] sm:$0xff] %v2882_v51  ;;  %v1138_v51 = vadd.f32 %v1137_v58, %v752_v57  ;;  %v1527_v57 = vmax.f32 %v1459_v23, 0.0 }
 0x13a   : > { %v1142_v53 = vadd.f32 %v1141_v3, %v756_v18  ;;  %v1462_v45 = vadd.f32 %v2818_v50, %v1140_v24  ;;  %v1797_v3 = vmul.f32 %v2814_v10, %v1525_v54  ;;  %v1849_v10 = vadd.f32 %v2866_v27, %v1796_v61 }
 0x13b   : > { %v760_v0 = vpop.f32.mrf.mxu0  ;;  %v1145_v28 = vpop.f32.mrf.mxu1  ;;  %v1461_v22 = vadd.f32 %v2808_v9, %v1138_v51  ;;  %v1799_v51 = vmul.f32 %v2824_v63, %v1527_v57 }
 0x13c   : > { %v2888_v48 = vpop.permute.xlu0 %1390  ;;  %v1146_v55 = vadd.f32 %v1145_v28, %v760_v0  ;;  %v1463_v18 = vadd.f32 %v2818_v50, %v1142_v53  ;;  %v1528_v0 = vmax.f32 %v1460_v11, 0.0  ;;  %v2906_v50 = vpop.permute.xlu1 %1725 }
 0x13d   : > { %v762_v25 = vpop.f32.mrf.mxu0  ;;  %v1147_v5 = vpop.f32.mrf.mxu1  ;;  %v1529_v28 = vmax.f32 %v1461_v22, 0.0 }
 0x13e   : > { %v1148_v58 = vadd.f32 %v1147_v5, %v762_v25  ;;  %v1464_v25 = vadd.f32 %v2828_v6, %v1146_v55  ;;  %v1798_v5 = vmul.f32 %v2824_v63, %v1526_v56 }
 0x13f   : > { %v764_v7 = vpop.f32.mrf.mxu0  ;;  %v1149_v8 = vpop.f32.mrf.mxu1 }
 0x140   : > { %v2896_v38 = vpop.permute.xlu0 %1395  ;;  %v1150_v20 = vadd.f32 %v1149_v8, %v764_v7  ;;  %v1465_v14 = vadd.f32 %v2828_v6, %v1148_v58  ;;  %v1530_v7 = vmax.f32 %v1462_v45, 0.0  ;;  %v1531_v8 = vmax.f32 %v1463_v18, 0.0 }
 0x141   : > { %v766_v29 = vpop.f32.mrf.mxu0  ;;  %v1151_v30 = vpop.f32.mrf.mxu1  ;;  %v1532_v55 = vmax.f32 %v1464_v25, 0.0  ;;  %v1850_v56 = vadd.f32 %v1849_v10, %v1798_v5 }
 0x142   : > { %v1152_v43 = vadd.f32 %v1151_v30, %v766_v29  ;;  %v1888_v30 = vadd.f32 %v2870_v21, %v1797_v3  ;;  %v1466_v53 = vadd.f32 %v2838_v47, %v1150_v20  ;;  %v2921_v20 = vpop.permute.xlu1 %1730 }
 0x143   : > { %v770_v19 = vpop.f32.mrf.mxu0  ;;  %v1155_v33 = vpop.f32.mrf.mxu1 }
 0x144   : > { %v1156_v23 = vadd.f32 %v1155_v33, %v770_v19  ;;  %v1467_v54 = vadd.f32 %v2838_v47, %v1152_v43  ;;  %v2912_v6 = vpop.permute.xlu0 %1400  ;;  %v1800_v19 = vmul.f32 %v2834_v39, %v1528_v0  ;;  %v1801_v33 = vmul.f32 %v2834_v39, %v1529_v28 }
 0x145   : > { %v772_v16 = vpop.f32.mrf.mxu0  ;;  %v1157_v36 = vpop.f32.mrf.mxu1  ;;  %v1889_v57 = vadd.f32 %v1888_v30, %v1799_v51  ;;  %v1802_v47 = vmul.f32 %v2844_v59, %v1530_v7  ;;  %v1534_v45 = vmax.f32 %v1466_v53, 0.0  ;;  %v1804_v28 = vmul.f32 %v2854_v31, %v1532_v55 }
 0x146   : > { %v1158_v29 = vadd.f32 %v1157_v36, %v772_v16  ;;  %v1533_v16 = vmax.f32 %v1465_v14, 0.0  ;;  %v1468_v21 = vadd.f32 %v2848_v4, %v1156_v23  ;;  %v1535_v18 = vmax.f32 %v1467_v54, 0.0 }
 0x147   : > { %v774_v26 = vpop.f32.mrf.mxu0  ;;  %v1159_v1 = vpop.f32.mrf.mxu1  ;;  %v1851_v43 = vadd.f32 %v1850_v56, %v1800_v19  ;;  %v1890_v0 = vadd.f32 %v1889_v57, %v1801_v33  ;;  %v1806_v7 = vmul.f32 %v2863_v2, %v1534_v45 }
 0x148   : > { %v1160_v11 = vadd.f32 %v1159_v1, %v774_v26  ;;  %v1803_v26 = vmul.f32 %v2844_v59, %v1531_v8  ;;  %v1469_v1 = vadd.f32 %v2848_v4, %v1158_v29  ;;  %v1805_v59 = vmul.f32 %v2854_v31, %v1533_v16  ;;  %v2926_v14 = vpop.permute.xlu0 %1405 }
 0x149   : > { %v776_v35 = vpop.f32.mrf.mxu0  ;;  %v1161_v17 = vpop.f32.mrf.mxu1  ;;  %v1536_v5 = vmax.f32 %v1468_v21, 0.0  ;;  %v1807_v8 = vmul.f32 %v2863_v2, %v1535_v18 }
 0x14a   : > { %v1162_v27 = vadd.f32 %v1161_v17, %v776_v35  ;;  %v1470_v39 = vadd.f32 %v2858_v40, %v1160_v11  ;;  %v1537_v23 = vmax.f32 %v1469_v1, 0.0 }
 0x14b   : > { %v780_v44 = vpop.f32.mrf.mxu0  ;;  %v1165_v46 = vpop.f32.mrf.mxu1  ;;  %v1808_v54 = vmul.f32 %v2872_v60, %v1536_v5 }
 0x14c   : > { %v1166_v61 = vadd.f32 %v1165_v46, %v780_v44  ;;  %v1471_v25 = vadd.f32 %v2858_v40, %v1162_v27  ;;  %v1538_v29 = vmax.f32 %v1470_v39, 0.0  ;;  %v2935_v27 = vpop.permute.xlu1 %1735  ;;  %v1809_v2 = vmul.f32 %v2872_v60, %v1537_v23  ;;  %v3009_v23 = vld [vmem:[#allocation5_spill] sm:$0xff] }
 0x14d   : > { %v782_v41 = vpop.f32.mrf.mxu0  ;;  %v1167_v34 = vpop.f32.mrf.mxu1 }
 0x14e   : > { %v1168_v3 = vadd.f32 %v1167_v34, %v782_v41  ;;  %v1852_v41 = vadd.f32 %v1851_v43, %v1802_v47  ;;  %v1891_v34 = vadd.f32 %v1890_v0, %v1803_v26  ;;  %v1472_v10 = vadd.f32 %v2868_v42, %v1166_v61  ;;  %v2939_v47 = vpop.permute.xlu0 %1410  ;;  %v3008_v43 = vld [vmem:[#allocation4_spill] sm:$0xff] }
 0x14f   : > { %v784_v37 = vpop.f32.mrf.mxu0  ;;  %v1169_v52 = vpop.f32.mrf.mxu1 }
 0x150   : > { %v1170_v4 = vadd.f32 %v1169_v52, %v784_v37  ;;  %v1473_v40 = vadd.f32 %v2868_v42, %v1168_v3  ;;  %v1853_v37 = vadd.f32 %v1852_v41, %v1804_v28  ;;  %v1539_v52 = vmax.f32 %v1471_v25, 0.0 }
 0x151   : > { %v786_v12 = vpop.f32.mrf.mxu0  ;;  %v1171_v9 = vpop.f32.mrf.mxu1  ;;  %v1892_v53 = vadd.f32 %v1891_v34, %v1805_v59  ;;  %v1540_v42 = vmax.f32 %v1472_v10, 0.0 }
 0x152   : > { %v1172_v44 = vadd.f32 %v1171_v9, %v786_v12  ;;  %v1474_v11 = vadd.f32 %v2874_v62, %v1170_v4  ;;  %v1854_v16 = vadd.f32 %v1853_v37, %v1806_v7 }
 0x153   : > { %v790_v49 = vpop.f32.mrf.mxu0  ;;  %v1175_v24 = vpop.f32.mrf.mxu1  ;;  %v1893_v21 = vadd.f32 %v1892_v53, %v1807_v8 }
 0x154   : > { %v1176_v12 = vadd.f32 %v1175_v24, %v790_v49  ;;  %v1475_v19 = vadd.f32 %v2874_v62, %v1172_v44  ;;  %v1810_v49 = vmul.f32 %v2876_v15, %v1538_v29  ;;  %v1541_v24 = vmax.f32 %v1473_v40, 0.0  ;;  %v2948_v44 = vpop.permute.xlu1 %1740 }
 0x155   : > { %v792_v63 = vpop.f32.mrf.mxu0  ;;  %v1177_v22 = vpop.f32.mrf.mxu1  ;;  %v1811_v62 = vmul.f32 %v2876_v15, %v1539_v52  ;;  %v1855_v60 = vadd.f32 %v1854_v16, %v1808_v54  ;;  %v1542_v45 = vmax.f32 %v1474_v11, 0.0  ;;  %v1894_v3 = vadd.f32 %v1893_v21, %v1809_v2 }
 0x156   : > { %v1178_v9 = vadd.f32 %v1177_v22, %v792_v63  ;;  %v1476_v26 = vadd.f32 %v2878_v13, %v1176_v12 }
 0x157   : > { %v794_v36 = vpop.f32.mrf.mxu0  ;;  %v1179_v58 = vpop.f32.mrf.mxu1  ;;  %v1856_v25 = vadd.f32 %v1855_v60, %v1810_v49  ;;  %v1814_v10 = vmul.f32 %v3009_v23, %v1542_v45 }
 0x158   : > { %v1180_v56 = vadd.f32 %v1179_v58, %v794_v36  ;;  %v1477_v1 = vadd.f32 %v2878_v13, %v1178_v9  ;;  %v1543_v36 = vmax.f32 %v1475_v19, 0.0 }
 0x159   : > { %v796_v35 = vpop.f32.mrf.mxu0  ;;  %v1181_v17 = vpop.f32.mrf.mxu1 }
 0x15a   : > { %v1182_v57 = vadd.f32 %v1181_v17, %v796_v35  ;;  %v3007_v35 = vld [vmem:[#allocation3_spill] sm:$0xff]  ;;  %v1478_v0 = vadd.f32 %v3008_v43, %v1180_v56  ;;  %v1545_v41 = vmax.f32 %v1477_v1, 0.0  ;;  %v1815_v7 = vmul.f32 %v3009_v23, %v1543_v36 }
 0x15b   : > { %v800_v46 = vpop.f32.mrf.mxu0  ;;  %v1185_v51 = vpop.f32.mrf.mxu1  ;;  %v1812_v17 = vmul.f32 %v3007_v35, %v1540_v42  ;;  %v1813_v15 = vmul.f32 %v3007_v35, %v1541_v24 }
 0x15c   : > { %v1186_v61 = vadd.f32 %v1185_v51, %v800_v46  ;;  %v1479_v28 = vadd.f32 %v3008_v43, %v1182_v57  ;;  %v1895_v46 = vadd.f32 %v1894_v3, %v1811_v62  ;;  %v1544_v51 = vmax.f32 %v1476_v26, 0.0 }
 0x15d   : > { %v802_v31 = vpop.f32.mrf.mxu0  ;;  %v1187_v30 = vpop.f32.mrf.mxu1  ;;  %v1857_v37 = vadd.f32 %v1856_v25, %v1812_v17  ;;  %v1546_v52 = vmax.f32 %v1478_v0, 0.0 }
 0x15e   : > { %v1188_v58 = vadd.f32 %v1187_v30, %v802_v31  ;;  %v1480_v34 = vadd.f32 %v2888_v48, %v1186_v61  ;;  %v2954_v30 = vpop.permute.xlu0 %1415  ;;  %v1547_v12 = vmax.f32 %v1479_v28, 0.0  ;;  %v1896_v53 = vadd.f32 %v1895_v46, %v1813_v15 }
 0x15f   : > { %v804_v33 = vpop.f32.mrf.mxu0  ;;  %v1189_v55 = vpop.f32.mrf.mxu1  ;;  %v1816_v2 = vmul.f32 %v2892_v32, %v1544_v51  ;;  %v1858_v57 = vadd.f32 %v1857_v37, %v1814_v10  ;;  %v1818_v62 = vmul.f32 %v2906_v50, %v1546_v52 }
 0x160   : > { %v1190_v59 = vadd.f32 %v1189_v55, %v804_v33  ;;  %v1481_v8 = vadd.f32 %v2888_v48, %v1188_v58  ;;  %v1817_v48 = vmul.f32 %v2892_v32, %v1545_v41  ;;  %v1548_v42 = vmax.f32 %v1480_v34, 0.0 }
 0x161   : > { %v806_v63 = vpop.f32.mrf.mxu0  ;;  %v1191_v22 = vpop.f32.mrf.mxu1  ;;  %v1897_v16 = vadd.f32 %v1896_v53, %v1815_v7 }
 0x162   : > { %v1192_v5 = vadd.f32 %v1191_v22, %v806_v63  ;;  %v1482_v54 = vadd.f32 %v2896_v38, %v1190_v59  ;;  %v1549_v21 = vmax.f32 %v1481_v8, 0.0  ;;  %v1746_v22 = vpop.permute.xlu1 %1745  ;;  %v1421_v58 = vpop.permute.xlu0 %1420  ;;  %v1820_v3 = vmul.f32 %v2921_v20, %v1548_v42 }
 0x163   : > { %v810_v18 = vpop.f32.mrf.mxu0  ;;  %v1195_v39 = vpop.f32.mrf.mxu1 }
 0x164   : > { %v1196_v29 = vadd.f32 %v1195_v39, %v810_v18  ;;  %v1483_v11 = vadd.f32 %v2896_v38, %v1192_v5  ;;  %v1819_v38 = vmul.f32 %v2906_v50, %v1547_v12  ;;  %v1550_v61 = vmax.f32 %v1482_v54, 0.0 }
 0x165   : > { %v812_v13 = vpop.f32.mrf.mxu0  ;;  %v1197_v4 = vpop.f32.mrf.mxu1  ;;  %v1859_v18 = vadd.f32 %v1858_v57, %v1816_v2  ;;  %v1898_v39 = vadd.f32 %v1897_v16, %v1817_v48  ;;  %v1821_v17 = vmul.f32 %v2921_v20, %v1549_v21 }
 0x166   : > { %v1198_v9 = vadd.f32 %v1197_v4, %v812_v13  ;;  %v1484_v49 = vadd.f32 %v2912_v6, %v1196_v29  ;;  %v1551_v60 = vmax.f32 %v1483_v11, 0.0  ;;  %v1822_v13 = vmul.f32 %v2935_v27, %v1550_v61  ;;  %v1751_v20 = vpop.permute.xlu1 %1750  ;;  %v1426_v52 = vpop.permute.xlu0 %1425 }
 0x167   : > { %v814_v40 = vpop.f32.mrf.mxu0  ;;  %v1199_v31 = vpop.f32.mrf.mxu1  ;;  %v1860_v25 = vadd.f32 %v1859_v18, %v1818_v62  ;;  %v1899_v15 = vadd.f32 %v1898_v39, %v1819_v38 }
 0x168   : > { %v1200_v19 = vadd.f32 %v1199_v31, %v814_v40  ;;  %v1485_v26 = vadd.f32 %v2912_v6, %v1198_v9  ;;  %v1552_v43 = vmax.f32 %v1484_v49, 0.0  ;;  %v1823_v4 = vmul.f32 %v2935_v27, %v1551_v60 }
 0x169   : > { %v816_v33 = vpop.f32.mrf.mxu0  ;;  %v1201_v55 = vpop.f32.mrf.mxu1  ;;  %v1861_v7 = vadd.f32 %v1860_v25, %v1820_v3  ;;  %v1900_v8 = vadd.f32 %v1899_v15, %v1821_v17 }
 0x16a   : > { %v1202_v56 = vadd.f32 %v1201_v55, %v816_v33  ;;  %v1486_v32 = vadd.f32 %v2926_v14, %v1200_v19  ;;  %v1553_v59 = vmax.f32 %v1485_v26, 0.0  ;;  %v1824_v29 = vmul.f32 %v2948_v44, %v1552_v43 }
 0x16b   : > { %v820_v24 = vpop.f32.mrf.mxu0  ;;  %v1205_v63 = vpop.f32.mrf.mxu1  ;;  %v1862_v53 = vadd.f32 %v1861_v7, %v1822_v13  ;;  %v1901_v54 = vadd.f32 %v1900_v8, %v1823_v4 }
 0x16c   : > { %v1206_v1 = vadd.f32 %v1205_v63, %v820_v24  ;;  %v1487_v35 = vadd.f32 %v2926_v14, %v1202_v56  ;;  %v1554_v46 = vmax.f32 %v1486_v32, 0.0  ;;  %v1825_v27 = vmul.f32 %v2948_v44, %v1553_v59  ;;  %v1756_v44 = vpop.permute.xlu1 %1755 }
 0x16d   : > { %v822_v45 = vpop.f32.mrf.mxu0  ;;  %v1207_v36 = vpop.f32.mrf.mxu1  ;;  %v1863_v57 = vadd.f32 %v1862_v53, %v1824_v29  ;;  %v1915_v29 = vstv %s1914_s21 }
 0x16e   : > { %v1488_v50 = vadd.f32 %v2939_v47, %v1206_v1  ;;  %v1208_v6 = vadd.f32 %v1207_v36, %v822_v45  ;;  %v1555_v34 = vmax.f32 %v1487_v35, 0.0  ;;  %v1826_v11 = vmul.f32 %v1746_v22, %v1554_v46 }
 0x16f   : > { %v824_v0 = vpop.f32.mrf.mxu0  ;;  %v1209_v28 = vpop.f32.mrf.mxu1  ;;  %v1902_v24 = vadd.f32 %v1901_v54, %v1825_v27 }
 0x170   : > { %v1210_v5 = vadd.f32 %v1209_v28, %v824_v0  ;;  %v1489_v51 = vadd.f32 %v2939_v47, %v1208_v6  ;;  %v1556_v40 = vmax.f32 %v1488_v50, 0.0  ;;  %v1827_v2 = vmul.f32 %v1746_v22, %v1555_v34  ;;  %v1761_v22 = vpop.permute.xlu0 %1760  ;;  %v1766_v28 = vpop.permute.xlu1 %1765 }
 0x171   : > { %v826_v14 = vpop.f32.mrf.mxu0  ;;  %v1211_v41 = vpop.f32.mrf.mxu1  ;;  %v1864_v38 = vadd.f32 %v1863_v57, %v1826_v11 }
 0x172   : > { %v1490_v23 = vadd.f32 %v2954_v30, %v1210_v5  ;;  %v1212_v10 = vadd.f32 %v1211_v41, %v826_v14  ;;  %v1557_v12 = vmax.f32 %v1489_v51, 0.0  ;;  %v1828_v16 = vmul.f32 %v1751_v20, %v1556_v40 }
 0x173   : > { %v830_v31 = vpop.f32.mrf.mxu0  ;;  %v1215_v37 = vpop.f32.mrf.mxu1  ;;  %v1903_v32 = vadd.f32 %v1902_v24, %v1827_v2 }
 0x174   : > { %v1491_v47 = vadd.f32 %v2954_v30, %v1212_v10  ;;  %v1216_v9 = vadd.f32 %v1215_v37, %v830_v31  ;;  %v1558_v19 = vmax.f32 %v1490_v23, 0.0  ;;  %v1829_v63 = vmul.f32 %v1751_v20, %v1557_v12 }
 0x175   : > { %v832_v33 = vpop.f32.mrf.mxu0  ;;  %v1217_v55 = vpop.f32.mrf.mxu1  ;;  %v1865_v39 = vadd.f32 %v1864_v38, %v1828_v16 }
 0x176   : > { %v1559_v48 = vmax.f32 %v1491_v47, 0.0  ;;  %v2976_v42 = vadd.f32 %v1421_v58, %v1216_v9  ;;  %v1218_v56 = vadd.f32 %v1217_v55, %v832_v33  ;;  %v1830_v26 = vmul.f32 %v1756_v44, %v1558_v19 }
 0x177   : > { %v834_v21 = vpop.f32.mrf.mxu0  ;;  %v1219_v49 = vpop.f32.mrf.mxu1  ;;  %v1904_v17 = vadd.f32 %v1903_v32, %v1829_v63  ;;  %v1950_v63 = vlaneseq }
 0x178   : > { %v1560_v30 = vmax.f32 %v2976_v42, 0.0  ;;  %v1493_v62 = vadd.f32 %v1421_v58, %v1218_v56  ;;  %v1220_v1 = vadd.f32 %v1219_v49, %v834_v21  ;;  %v1831_v45 = vmul.f32 %v1756_v44, %v1559_v48 }
 0x179   : > { %v836_v61 = vpop.f32.mrf.mxu0  ;;  %v1221_v60 = vpop.f32.mrf.mxu1  ;;  %v1866_v6 = vadd.f32 %v1865_v39, %v1830_v26  ;;  %v2301_v44 = vmov 1966171168   ;;  %v1951_v38 = vshrl.u32 %v1950_v63, 7  ;;  %vm1964_vm0 = vcmp.lt.s32.totalorder %v1950_v63, 256 }
 0x17a   : > { %v1561_v36 = vmax.f32 %v1493_v62, 0.0  ;;  %v1222_v18 = vadd.f32 %v1221_v60, %v836_v61  ;;  %v1832_v3 = vmul.f32 %v1761_v22, %v1560_v30  ;;  %v1494_v35 = vadd.f32 %v1426_v52, %v1220_v1 }
 0x17b   : > { %v1905_v58 = vadd.f32 %v1904_v17, %v1831_v45  ;;  %v1948_v24 = vunpack.c.l.s4 %v2301_v44 }
 0x17c   : > { %v1833_v43 = vmul.f32 %v1761_v22, %v1561_v36  ;;  %v1495_v50 = vadd.f32 %v1426_v52, %v1222_v18  ;;  %v1562_v0 = vmax.f32 %v1494_v35, 0.0  ;;  %v1867_v15 = vadd.f32 %v1866_v6, %v1832_v3 }
 0x17d   : > { %v1949_v30 = vunpack.c.0.s8 %v1948_v24 }
 0x17e   : > { %v1563_v25 = vmax.f32 %v1495_v50, 0.0  ;;  %v1834_v59 = vmul.f32 %v1766_v28, %v1562_v0  ;;  %v1906_v5 = vadd.f32 %v1905_v58, %v1833_v43 }
 0x17f   : > { %v1952_v1 = vsub.s32 %v1949_v30, %v1951_v38 }
 0x180   : > { %v1835_v13 = vmul.f32 %v1766_v28, %v1563_v25  ;;  %v1868_v4 = vadd.f32 %v1867_v15, %v1834_v59 }
 0x182   : > { %v1907_v46 = vadd.f32 %v1906_v5, %v1835_v13  ;;  %v1869_v51 = vrot.slane %v1868_v4, 4 }
 0x184   : > { %v1908_v14 = vrot.slane %v1907_v46, 4  ;;  %v1870_v41 = vadd.f32 %v1869_v51, %v1868_v4 }
 0x186   : > { %v1909_v20 = vadd.f32 %v1908_v14, %v1907_v46  ;;  %v1871_v34 = vrot.slane %v1870_v41, 2 }
 0x188   : > { %v1910_v23 = vrot.slane %v1909_v20, 2  ;;  %v1872_v10 = vadd.f32 %v1871_v34, %v1870_v41 }
 0x18a   : > { %v1911_v7 = vadd.f32 %v1910_v23, %v1909_v20  ;;  %v1873_v8 = vrot.slane %v1872_v10, 1 }
 0x18c   : > { %v1912_v40 = vrot.slane %v1911_v7, 1  ;;  %v1874_v31 = vadd.f32 %v1873_v8, %v1872_v10 }
 0x18e   : > { %v1913_v37 = vadd.f32 %v1912_v40, %v1911_v7  ;;  %v1916_v52 = vadd.f32 %v1915_v29, %v1874_v31 }
 0x190   : > { %v1917_v27 = vadd.f32 %v1915_v29, %v1913_v37  ;;  %v2142_v12 = vmul.f32 -1.442695, %v1916_v52 }
 0x192   : > { %v2143_v47 = vmul.f32 -1.442695, %v1917_v27  ;;  %2260 = vpow2.f32 %v2142_v12 }
 0x194   : > { %2262 = vpow2.f32 %v2143_v47 }
 0x19f   : > { %v2261_v9 = vpop.eup %2260 }
 0x1a0   : > { %v1924_v54 = vadd.f32 1.0, %v2261_v9 }
 0x1a1   : > { %v2263_v53 = vpop.eup %2262 }
 0x1a2   : > { %v1925_v11 = vadd.f32 1.0, %v2263_v53  ;;  %2264 = vrcp.f32 %v1924_v54 }
 0x1a4   : > { %2266 = vrcp.f32 %v1925_v11 }
 0x1af   : > { %v2265_v19 = vpop.eup %2264 }
 0x1b0   : > { %v1930_v55 = vmul.f32 %v2265_v19, %v2976_v42 }
 0x1b1   : > { %v2267_v33 = vpop.eup %2266 }
 0x1b2   : > { %v1931_v2 = vmul.f32 %v2267_v33, %v1493_v62  ;;  %v2144_v48 = vmul.f32 -1.442695, %v1930_v55 }
 0x1b4   : > { %v2145_v56 = vmul.f32 -1.442695, %v1931_v2  ;;  %2268 = vpow2.f32 %v2144_v48 }
 0x1b6   : > { %2270 = vpow2.f32 %v2145_v56 }
 0x1c1   : > { %v2269_v57 = vpop.eup %2268 }
 0x1c2   : > { %v1938_v21 = vadd.f32 1.0, %v2269_v57 }
 0x1c3   : > { %v2271_v16 = vpop.eup %2270 }
 0x1c4   : > { %v1939_v49 = vadd.f32 1.0, %v2271_v16  ;;  %2272 = vrcp.f32 %v1938_v21 }
 0x1c6   : > { %2274 = vrcp.f32 %v1939_v49 }
 0x1d1   : > { %v2273_v26 = vpop.eup %2272 }
 0x1d3   : > { %v2275_v42 = vpop.eup %2274 }
 0x1d4   : > { %v1946_v62 = vcombine.low %v2273_v26, %v2275_v42 }
 0x1d6   : > { %v1953_v61 = vrot.slane %v1946_v62, %v1952_v1 }
 0x1d8   : > { %v1960_v60 = vrot.slane %v1953_v61, %v1952_v1 }
 0x1da   : > { %1966 = vst.msk [vmem:[%s351_s23] sm:$0x3] %vm1964_vm0, %v1960_v60 }
 0x1db PF: > { %s18_s28 = sadd.s32 1, %s2298_s28   ;;  %s3010_s26 = smov %s2294_s27 }
 0x1dc   : > { %p15_p5 = scmp.ge.s32.totalorder %s18_s28, 4   ;;  %s3011_s27 = smov %s3013_s6 }
 0x1de   :  { %17 = sbr.rel (!%p15_p5) target bundleno = 2 (0x2), region = 81 }

</bundles_post_ra>
